<compile_context>
chip_gen: v7x
topology: tpu7x:2x2x1
jax: 0.10.0
libtpu: 0.0.40
codegen_flags: <defaults>
</compile_context>

<pallas_src>
import math

import numpy as np
import jax
import jax.numpy as jnp
from jax.experimental import pallas as pl
from jax.experimental.pallas import tpu as pltpu

HIDDEN = 32
NUM_HEADS = 8
HEAD_DIM = HIDDEN // NUM_HEADS            # 4
SCALE = 1.0 / math.sqrt(HEAD_DIM)

PACK = 4                                  # tokens packed per 128-lane row
LANES = PACK * HIDDEN                     # 128
QCOLS = NUM_HEADS * LANES                 # 1024 replicated-Q columns
PROJ_COLS = QCOLS + 2 * LANES             # 1280: [q_rep x 8 | k | v]
ROW_TILE = 512                            # packed rows per grid step (= 2048 tokens)
GROUP = PACK * HEAD_DIM                   # 16: lane period of the key-head axis


def pack_mha_params(params):
    """One-time preprocessing of nn.Linear params into kernel-friendly constants.

    Linear weights are expected pre-transposed to (in, out) so y = x @ w + b.

    Lane layouts:
      * input / output rows: lane = 32*t + c          (t packed token, c channel)
      * Q/K/V intermediates: lane = 16*g + 4*t + d    (g key head, d head dim)
        -> a (token, query-head) softmax group occupies one lane residue class
           mod 16, so its max is reachable with rolls by 16/32/64.
    """
    wq = np.asarray(params["wq"], np.float32)
    wk = np.asarray(params["wk"], np.float32)
    wv = np.asarray(params["wv"], np.float32)
    wp = np.asarray(params["wp"], np.float32)
    bq = np.asarray(params["bq"], np.float32).reshape(-1)
    bk = np.asarray(params["bk"], np.float32).reshape(-1)
    bv = np.asarray(params["bv"], np.float32).reshape(-1)
    bp = np.asarray(params["bp"], np.float32).reshape(-1)

    # input-row lane decomposition: lane = 32*t + c
    in_lane = np.arange(LANES)
    in_t, in_c = in_lane // HIDDEN, in_lane % HIDDEN

    # QKV lane decomposition: lane = 16*g + 4*t + d
    kv_lane = np.arange(LANES)
    kv_g = kv_lane // GROUP
    kv_t = (kv_lane % GROUP) // HEAD_DIM
    kv_d = kv_lane % HEAD_DIM
    kv_ch = HEAD_DIM * kv_g + kv_d                      # channel 4*g + d

    tok_match = (in_t[:, None] == kv_t[None, :]).astype(np.float32)
    wk_p = wk[in_c[:, None], kv_ch[None, :]] * tok_match          # (128, 128)
    wv_p = wv[in_c[:, None], kv_ch[None, :]] * tok_match          # (128, 128)
    bk_p = bk[kv_ch]
    bv_p = bv[kv_ch]

    # Replicated, pre-scaled Q: column 128*h + (16*g + 4*t + d) = SCALE*Q[t,h,d]
    q_col = np.arange(QCOLS)
    q_h = q_col // LANES
    q_lane = q_col % LANES
    q_t = (q_lane % GROUP) // HEAD_DIM
    q_d = q_lane % HEAD_DIM
    q_ch = HEAD_DIM * q_h + q_d
    wq_rep = (SCALE * wq[in_c[:, None], q_ch[None, :]]
              * (in_t[:, None] == q_t[None, :]).astype(np.float32))  # (128, 1024)
    bq_rep = SCALE * bq[q_ch]                                        # (1024,)

    w_all = np.concatenate([wq_rep, wk_p, wv_p], axis=1)             # (128, 1280)
    b_all = np.concatenate([bq_rep, bk_p, bv_p])[None, :]            # (1, 1280)

    # Sum over head_dim within each 4-lane group, broadcast back (0/1 matrix).
    sum_rep = np.kron(np.eye(LANES // HEAD_DIM, dtype=np.float32),
                      np.ones((HEAD_DIM, HEAD_DIM), np.float32))     # (128, 128)
    # Sum of exp over a token's 8 key heads (values d-replicated x4, hence the
    # 1/4 factor), broadcast to all of the token's lanes.  Entries 0 / 0.25.
    tok_sum = (kv_t[:, None] == kv_t[None, :]).astype(np.float32) / HEAD_DIM

    # Folded (sum over key heads) + head-slot placement + output projection,
    # batched over the 8 query heads: row 128*h + (16*g + 4*t + d),
    # col 32*t' + c  ->  wp[4*h + d, c] * [t == t'].
    r = np.arange(NUM_HEADS * LANES)
    r_h = r // LANES
    r_lane = r % LANES
    r_t = (r_lane % GROUP) // HEAD_DIM
    r_d = r_lane % HEAD_DIM
    o_lane = np.arange(LANES)
    o_t, o_c = o_lane // HIDDEN, o_lane % HIDDEN
    wp_all = (wp[(HEAD_DIM * r_h + r_d)[:, None], o_c[None, :]]
              * (r_t[:, None] == o_t[None, :]).astype(np.float32))   # (1024, 128)
    bp_rep = np.tile(bp, PACK)[None, :]                               # (1, 128)

    # bf16 matmul operands (0/1 and 0.25 constants are exact in bf16); biases
    # stay f32 and are added after the f32-accumulated matmuls.
    return dict(
        w_all=jnp.asarray(w_all, jnp.bfloat16),
        b_all=jnp.asarray(b_all, jnp.float32),
        sum_rep=jnp.asarray(sum_rep, jnp.bfloat16),
        tok_sum=jnp.asarray(tok_sum, jnp.bfloat16),
        wp_all=jnp.asarray(wp_all, jnp.bfloat16),
        bp_rep=jnp.asarray(bp_rep, jnp.float32),
    )


def mha_kernel(x_ref, w_all_ref, b_all_ref, sum_rep_ref, tok_sum_ref,
               wp_all_ref, bp_rep_ref, o_ref):
    x = x_ref[...].astype(jnp.bfloat16)                # (row_tile, 128) = 4 tokens/row

    # Fused, lane-packed Q(replicated x8)/K/V projection: one bf16 MXU matmul,
    # f32 accumulation, f32 bias add.
    proj = jnp.dot(x, w_all_ref[...],
                   preferred_element_type=jnp.float32) + b_all_ref[...]
    k = proj[:, QCOLS:QCOLS + LANES]                   # lane 16g+4t+d = K[t, g, d]
    v = proj[:, QCOLS + LANES:]                        # lane 16g+4t+d = V[t, g, d]

    sum_rep = sum_rep_ref[...]                         # bf16 0/1
    tok_sum = tok_sum_ref[...]                         # bf16 0/0.25

    pv_parts = []
    for hh in range(NUM_HEADS):                        # unrolled over 8 query heads
        qh = proj[:, hh * LANES:(hh + 1) * LANES]      # scaled Q[t, hh, d] per key slot
        # Scores S[t, hh, g], replicated over the 4 head_dim lanes of slot (t, g).
        s = jnp.dot((qh * k).astype(jnp.bfloat16), sum_rep,
                    preferred_element_type=jnp.float32)
        # Exact per-(token, query-head) softmax max: a group's 8 scores sit 16
        # lanes apart, so 3 roll+max steps reduce over all of them regardless of
        # roll direction, leaving the max replicated on every lane of the group.
        m = s
        m = jnp.maximum(m, pltpu.roll(m, shift=GROUP, axis=1))
        m = jnp.maximum(m, pltpu.roll(m, shift=2 * GROUP, axis=1))
        m = jnp.maximum(m, pltpu.roll(m, shift=4 * GROUP, axis=1))
        e = jnp.exp(s - m)                             # in (0, 1], f32 (EUP)
        den = jnp.dot(e.astype(jnp.bfloat16), tok_sum,
                      preferred_element_type=jnp.float32)   # >= 1 (max term is 1)
        p = e * pl.reciprocal(den, approx=True)        # softmax over the 8 key heads
        pv_parts.append((p * v).astype(jnp.bfloat16))  # (row_tile, 128), lane-aligned

    # Batched weighted-sum-over-V + head-slot placement + output projection:
    # one K=1024 MXU matmul instead of 8 K=128 matmuls + 7 accumulate adds.
    pv_all = jnp.concatenate(pv_parts, axis=1)         # (row_tile, 1024) bf16
    out = jnp.dot(pv_all, wp_all_ref[...], preferred_element_type=jnp.float32)
    o_ref[...] = (out + bp_rep_ref[...]).astype(o_ref.dtype)


def multi_head_attention(x, packed):
    """x: (seq, batch, HIDDEN) -> (seq, batch, HIDDEN)."""
    S, B, H = x.shape
    assert H == HIDDEN
    total = S * B * H
    rows = pl.cdiv(total, LANES)                       # packed rows (4 tokens each)

    # Keep tiles 8-aligned; for medium inputs cap the tile near rows/2 so the
    # grid has >= 2 "parallel" steps (both v7x TensorCores get work).
    row_tile = min(ROW_TILE, max(8, ((rows + 15) // 16) * 8))
    rows_padded = pl.cdiv(rows, row_tile) * row_tile

    flat = x.reshape(total)                            # stays in x.dtype
    pad = rows_padded * LANES - total
    if pad:
        flat = jnp.pad(flat, (0, pad))                 # only when ragged
    xp = flat.reshape(rows_padded, LANES)              # 4 tokens per 128-lane row

    def const2(shape):                                 # grid-invariant operand
        return pl.BlockSpec(shape, lambda i: (0, 0))

    out = pl.pallas_call(
        mha_kernel,
        out_shape=jax.ShapeDtypeStruct((rows_padded, LANES), x.dtype),
        grid_spec=pltpu.PrefetchScalarGridSpec(
            num_scalar_prefetch=0,
            grid=(rows_padded // row_tile,),
            in_specs=[
                pl.BlockSpec((row_tile, LANES), lambda i: (i, 0)),   # packed tokens
                const2((LANES, PROJ_COLS)),                          # w_all (bf16)
                const2((1, PROJ_COLS)),                              # b_all (f32)
                const2((LANES, LANES)),                              # sum_rep (bf16)
                const2((LANES, LANES)),                              # tok_sum (bf16)
                const2((NUM_HEADS * LANES, LANES)),                  # wp_all (bf16)
                const2((1, LANES)),                                  # bp_rep (f32)
            ],
            out_specs=pl.BlockSpec((row_tile, LANES), lambda i: (i, 0)),
        ),
        compiler_params=pltpu.CompilerParams(
            dimension_semantics=("parallel",),
            vmem_limit_bytes=40 * 1024 * 1024),
    )(xp, packed["w_all"], packed["b_all"], packed["sum_rep"],
      packed["tok_sum"], packed["wp_all"], packed["bp_rep"])

    y = out.reshape(rows_padded * LANES)
    if pad:
        y = y[:total]
    return y.reshape(S, B, H)


def ref_forward(x, p):
    """Pure-JAX reference reproducing the PyTorch forward exactly (f32)."""
    S, B, H = x.shape
    q = (x @ p["wq"] + p["bq"]).reshape(S, B, NUM_HEADS, HEAD_DIM)
    k = (x @ p["wk"] + p["bk"]).reshape(S, B, NUM_HEADS, HEAD_DIM)
    v = (x @ p["wv"] + p["bv"]).reshape(S, B, NUM_HEADS, HEAD_DIM)
    scores = jnp.einsum("sbhd,sbgd->sbhg", q, k) / math.sqrt(HEAD_DIM)
    attn = jax.nn.softmax(scores, axis=-1)
    out = jnp.einsum("sbhg,sbgd->sbhd", attn, v).reshape(S, B, H)
    return out @ p["wp"] + p["bp"]


def _check(x, params, packed, tag, atol=1e-2, rtol=1e-2):
    out = jax.block_until_ready(multi_head_attention(x, packed))
    ref = ref_forward(x, params)
    assert out.shape == x.shape
    # bf16 matmul operands + pl.reciprocal(approx=True) set the tolerance.
    assert jnp.allclose(out, ref, atol=atol, rtol=rtol), f"mismatch vs reference ({tag})"


if __name__ == "__main__":
    key = jax.random.PRNGKey(0)
    ks = jax.random.split(key, 11)

    # Deterministic synthetic parameters (nn.Linear shapes, pre-transposed to (in, out)).
    params = {
        "wq": 0.05 * jax.random.normal(ks[1], (HIDDEN, HIDDEN), jnp.float32),
        "wk": 0.05 * jax.random.normal(ks[2], (HIDDEN, HIDDEN), jnp.float32),
        "wv": 0.05 * jax.random.normal(ks[3], (HIDDEN, HIDDEN), jnp.float32),
        "wp": 0.05 * jax.random.normal(ks[4], (HIDDEN, HIDDEN), jnp.float32),
        "bq": 0.01 * jax.random.normal(ks[5], (1, HIDDEN), jnp.float32),
        "bk": 0.01 * jax.random.normal(ks[6], (1, HIDDEN), jnp.float32),
        "bv": 0.01 * jax.random.normal(ks[7], (1, HIDDEN), jnp.float32),
        "bp": 0.01 * jax.random.normal(ks[8], (1, HIDDEN), jnp.float32),
    }
    packed = pack_mha_params(params)

    # Small shape consistent with the module: (seq=8, batch=2, hidden=32).
    x = jax.random.normal(ks[0], (8, 2, HIDDEN), dtype=jnp.float32)
    _check(x, params, packed, "small")

    # Ragged shape: exercises multi-step grid (>= 2 steps) plus the padding path.
    x2 = jax.random.normal(ks[9], (257, 5, HIDDEN), dtype=jnp.float32)
    _check(x2, params, packed, "ragged")

    # Aligned shape: exercises the full ROW_TILE=512 tile and the no-pad path.
    x3 = jax.random.normal(ks[10], (256, 16, HIDDEN), dtype=jnp.float32)
    _check(x3, params, packed, "aligned")

    print("KERNEL_OK")
</pallas_src>

<mosaic_0001>
module attributes {stable_mosaic.version = 11 : i64} {
  func.func @mha_kernel(%arg0: i32, %arg1: memref<8x128xf32, #tpu.memory_space<vmem>>, %arg2: memref<128x1280xbf16, #tpu.memory_space<vmem>>, %arg3: memref<1x1280xf32, #tpu.memory_space<vmem>>, %arg4: memref<128x128xbf16, #tpu.memory_space<vmem>>, %arg5: memref<128x128xbf16, #tpu.memory_space<vmem>>, %arg6: memref<1024x128xbf16, #tpu.memory_space<vmem>>, %arg7: memref<1x128xf32, #tpu.memory_space<vmem>>, %arg8: memref<8x128xf32, #tpu.memory_space<vmem>>) attributes {dimension_semantics = [#tpu.dimension_semantics<parallel>], iteration_bounds = array<i64: 1>, scalar_prefetch = 0 : i64, scratch_operands = 0 : i64, tpu.core_type = #tpu.core_type<tc>, window_params = [{transform_indices = @transform_0, window_bounds = array<i64: 8, 128>}, {pipeline_mode = #tpu.pipeline_mode<synchronous>, transform_indices = @transform_1, window_bounds = array<i64: 128, 1280>}, {pipeline_mode = #tpu.pipeline_mode<synchronous>, transform_indices = @transform_2, window_bounds = array<i64: 1, 1280>}, {pipeline_mode = #tpu.pipeline_mode<synchronous>, transform_indices = @transform_3, window_bounds = array<i64: 128, 128>}, {pipeline_mode = #tpu.pipeline_mode<synchronous>, transform_indices = @transform_4, window_bounds = array<i64: 128, 128>}, {pipeline_mode = #tpu.pipeline_mode<synchronous>, transform_indices = @transform_5, window_bounds = array<i64: 1024, 128>}, {pipeline_mode = #tpu.pipeline_mode<synchronous>, transform_indices = @transform_6, window_bounds = array<i64: 1, 128>}, {transform_indices = @transform_7, window_bounds = array<i64: 8, 128>}]} {
    %c0 = arith.constant 0 : index
    %c0_0 = arith.constant 0 : index
    %0 = vector.load %arg1[%c0, %c0_0] : memref<8x128xf32, #tpu.memory_space<vmem>>, vector<8x128xf32>
    %1 = arith.truncf %0 : vector<8x128xf32> to vector<8x128xbf16>
    %c0_1 = arith.constant 0 : index
    %c0_2 = arith.constant 0 : index
    %2 = vector.load %arg2[%c0_1, %c0_2] : memref<128x1280xbf16, #tpu.memory_space<vmem>>, vector<128x1280xbf16>
    %cst = arith.constant dense<0.000000e+00> : vector<8x1280xf32>
    %3 = tpu.matmul %1, %2, %cst {dimension_numbers = #tpu.dot_dimension_numbers<[1], [0], [0], [1], [0, 0, 1, 1], [], []>} : vector<8x128xbf16>, vector<128x1280xbf16>, vector<8x1280xf32> -> vector<8x1280xf32>
    %c0_3 = arith.constant 0 : index
    %c0_4 = arith.constant 0 : index
    %4 = vector.load %arg3[%c0_3, %c0_4] : memref<1x1280xf32, #tpu.memory_space<vmem>>, vector<1x1280xf32>
    %5 = vector.broadcast %4 : vector<1x1280xf32> to vector<8x1280xf32>
    %6 = arith.addf %3, %5 : vector<8x1280xf32>
    %7 = vector.extract_strided_slice %6 {offsets = [0, 1024], sizes = [8, 128], strides = [1, 1]} : vector<8x1280xf32> to vector<8x128xf32>
    %8 = vector.extract_strided_slice %6 {offsets = [0, 1152], sizes = [8, 128], strides = [1, 1]} : vector<8x1280xf32> to vector<8x128xf32>
    %c0_5 = arith.constant 0 : index
    %c0_6 = arith.constant 0 : index
    %9 = vector.load %arg4[%c0_5, %c0_6] : memref<128x128xbf16, #tpu.memory_space<vmem>>, vector<128x128xbf16>
    %c0_7 = arith.constant 0 : index
    %c0_8 = arith.constant 0 : index
    %10 = vector.load %arg5[%c0_7, %c0_8] : memref<128x128xbf16, #tpu.memory_space<vmem>>, vector<128x128xbf16>
    %11 = vector.extract_strided_slice %6 {offsets = [0, 0], sizes = [8, 128], strides = [1, 1]} : vector<8x1280xf32> to vector<8x128xf32>
    %12 = arith.mulf %11, %7 : vector<8x128xf32>
    %13 = arith.truncf %12 : vector<8x128xf32> to vector<8x128xbf16>
    %cst_9 = arith.constant dense<0.000000e+00> : vector<8x128xf32>
    %14 = tpu.matmul %13, %9, %cst_9 {dimension_numbers = #tpu.dot_dimension_numbers<[1], [0], [0], [1], [0, 0, 1, 1], [], []>} : vector<8x128xbf16>, vector<128x128xbf16>, vector<8x128xf32> -> vector<8x128xf32>
    %c16_i32 = arith.constant 16 : i32
    %15 = tpu.dynamic_rotate %14 by %c16_i32 dim 1 : vector<8x128xf32>, i32 -> vector<8x128xf32>
    %16 = arith.maximumf %14, %15 : vector<8x128xf32>
    %c32_i32 = arith.constant 32 : i32
    %17 = tpu.dynamic_rotate %16 by %c32_i32 dim 1 : vector<8x128xf32>, i32 -> vector<8x128xf32>
    %18 = arith.maximumf %16, %17 : vector<8x128xf32>
    %c64_i32 = arith.constant 64 : i32
    %19 = tpu.dynamic_rotate %18 by %c64_i32 dim 1 : vector<8x128xf32>, i32 -> vector<8x128xf32>
    %20 = arith.maximumf %18, %19 : vector<8x128xf32>
    %21 = arith.subf %14, %20 : vector<8x128xf32>
    %22 = math.exp %21 : vector<8x128xf32>
    %23 = arith.truncf %22 : vector<8x128xf32> to vector<8x128xbf16>
    %cst_10 = arith.constant dense<0.000000e+00> : vector<8x128xf32>
    %24 = tpu.matmul %23, %10, %cst_10 {dimension_numbers = #tpu.dot_dimension_numbers<[1], [0], [0], [1], [0, 0, 1, 1], [], []>} : vector<8x128xbf16>, vector<128x128xbf16>, vector<8x128xf32> -> vector<8x128xf32>
    %25 = tpu.reciprocal %24 {approx = true} : vector<8x128xf32> -> vector<8x128xf32>
    %26 = arith.mulf %22, %25 : vector<8x128xf32>
    %27 = arith.mulf %26, %8 : vector<8x128xf32>
    %28 = arith.truncf %27 : vector<8x128xf32> to vector<8x128xbf16>
    %29 = vector.extract_strided_slice %6 {offsets = [0, 128], sizes = [8, 128], strides = [1, 1]} : vector<8x1280xf32> to vector<8x128xf32>
    %30 = arith.mulf %29, %7 : vector<8x128xf32>
    %31 = arith.truncf %30 : vector<8x128xf32> to vector<8x128xbf16>
    %cst_11 = arith.constant dense<0.000000e+00> : vector<8x128xf32>
    %32 = tpu.matmul %31, %9, %cst_11 {dimension_numbers = #tpu.dot_dimension_numbers<[1], [0], [0], [1], [0, 0, 1, 1], [], []>} : vector<8x128xbf16>, vector<128x128xbf16>, vector<8x128xf32> -> vector<8x128xf32>
    %c16_i32_12 = arith.constant 16 : i32
    %33 = tpu.dynamic_rotate %32 by %c16_i32_12 dim 1 : vector<8x128xf32>, i32 -> vector<8x128xf32>
    %34 = arith.maximumf %32, %33 : vector<8x128xf32>
    %c32_i32_13 = arith.constant 32 : i32
    %35 = tpu.dynamic_rotate %34 by %c32_i32_13 dim 1 : vector<8x128xf32>, i32 -> vector<8x128xf32>
    %36 = arith.maximumf %34, %35 : vector<8x128xf32>
    %c64_i32_14 = arith.constant 64 : i32
    %37 = tpu.dynamic_rotate %36 by %c64_i32_14 dim 1 : vector<8x128xf32>, i32 -> vector<8x128xf32>
    %38 = arith.maximumf %36, %37 : vector<8x128xf32>
    %39 = arith.subf %32, %38 : vector<8x128xf32>
    %40 = math.exp %39 : vector<8x128xf32>
    %41 = arith.truncf %40 : vector<8x128xf32> to vector<8x128xbf16>
    %cst_15 = arith.constant dense<0.000000e+00> : vector<8x128xf32>
    %42 = tpu.matmul %41, %10, %cst_15 {dimension_numbers = #tpu.dot_dimension_numbers<[1], [0], [0], [1], [0, 0, 1, 1], [], []>} : vector<8x128xbf16>, vector<128x128xbf16>, vector<8x128xf32> -> vector<8x128xf32>
    %43 = tpu.reciprocal %42 {approx = true} : vector<8x128xf32> -> vector<8x128xf32>
    %44 = arith.mulf %40, %43 : vector<8x128xf32>
    %45 = arith.mulf %44, %8 : vector<8x128xf32>
    %46 = arith.truncf %45 : vector<8x128xf32> to vector<8x128xbf16>
    %47 = vector.extract_strided_slice %6 {offsets = [0, 256], sizes = [8, 128], strides = [1, 1]} : vector<8x1280xf32> to vector<8x128xf32>
    %48 = arith.mulf %47, %7 : vector<8x128xf32>
    %49 = arith.truncf %48 : vector<8x128xf32> to vector<8x128xbf16>
    %cst_16 = arith.constant dense<0.000000e+00> : vector<8x128xf32>
    %50 = tpu.matmul %49, %9, %cst_16 {dimension_numbers = #tpu.dot_dimension_numbers<[1], [0], [0], [1], [0, 0, 1, 1], [], []>} : vector<8x128xbf16>, vector<128x128xbf16>, vector<8x128xf32> -> vector<8x128xf32>
    %c16_i32_17 = arith.constant 16 : i32
    %51 = tpu.dynamic_rotate %50 by %c16_i32_17 dim 1 : vector<8x128xf32>, i32 -> vector<8x128xf32>
    %52 = arith.maximumf %50, %51 : vector<8x128xf32>
    %c32_i32_18 = arith.constant 32 : i32
    %53 = tpu.dynamic_rotate %52 by %c32_i32_18 dim 1 : vector<8x128xf32>, i32 -> vector<8x128xf32>
    %54 = arith.maximumf %52, %53 : vector<8x128xf32>
    %c64_i32_19 = arith.constant 64 : i32
    %55 = tpu.dynamic_rotate %54 by %c64_i32_19 dim 1 : vector<8x128xf32>, i32 -> vector<8x128xf32>
    %56 = arith.maximumf %54, %55 : vector<8x128xf32>
    %57 = arith.subf %50, %56 : vector<8x128xf32>
    %58 = math.exp %57 : vector<8x128xf32>
    %59 = arith.truncf %58 : vector<8x128xf32> to vector<8x128xbf16>
    %cst_20 = arith.constant dense<0.000000e+00> : vector<8x128xf32>
    %60 = tpu.matmul %59, %10, %cst_20 {dimension_numbers = #tpu.dot_dimension_numbers<[1], [0], [0], [1], [0, 0, 1, 1], [], []>} : vector<8x128xbf16>, vector<128x128xbf16>, vector<8x128xf32> -> vector<8x128xf32>
    %61 = tpu.reciprocal %60 {approx = true} : vector<8x128xf32> -> vector<8x128xf32>
    %62 = arith.mulf %58, %61 : vector<8x128xf32>
    %63 = arith.mulf %62, %8 : vector<8x128xf32>
    %64 = arith.truncf %63 : vector<8x128xf32> to vector<8x128xbf16>
    %65 = vector.extract_strided_slice %6 {offsets = [0, 384], sizes = [8, 128], strides = [1, 1]} : vector<8x1280xf32> to vector<8x128xf32>
    %66 = arith.mulf %65, %7 : vector<8x128xf32>
    %67 = arith.truncf %66 : vector<8x128xf32> to vector<8x128xbf16>
    %cst_21 = arith.constant dense<0.000000e+00> : vector<8x128xf32>
    %68 = tpu.matmul %67, %9, %cst_21 {dimension_numbers = #tpu.dot_dimension_numbers<[1], [0], [0], [1], [0, 0, 1, 1], [], []>} : vector<8x128xbf16>, vector<128x128xbf16>, vector<8x128xf32> -> vector<8x128xf32>
    %c16_i32_22 = arith.constant 16 : i32
    %69 = tpu.dynamic_rotate %68 by %c16_i32_22 dim 1 : vector<8x128xf32>, i32 -> vector<8x128xf32>
    %70 = arith.maximumf %68, %69 : vector<8x128xf32>
    %c32_i32_23 = arith.constant 32 : i32
    %71 = tpu.dynamic_rotate %70 by %c32_i32_23 dim 1 : vector<8x128xf32>, i32 -> vector<8x128xf32>
    %72 = arith.maximumf %70, %71 : vector<8x128xf32>
    %c64_i32_24 = arith.constant 64 : i32
    %73 = tpu.dynamic_rotate %72 by %c64_i32_24 dim 1 : vector<8x128xf32>, i32 -> vector<8x128xf32>
    %74 = arith.maximumf %72, %73 : vector<8x128xf32>
    %75 = arith.subf %68, %74 : vector<8x128xf32>
    %76 = math.exp %75 : vector<8x128xf32>
    %77 = arith.truncf %76 : vector<8x128xf32> to vector<8x128xbf16>
    %cst_25 = arith.constant dense<0.000000e+00> : vector<8x128xf32>
    %78 = tpu.matmul %77, %10, %cst_25 {dimension_numbers = #tpu.dot_dimension_numbers<[1], [0], [0], [1], [0, 0, 1, 1], [], []>} : vector<8x128xbf16>, vector<128x128xbf16>, vector<8x128xf32> -> vector<8x128xf32>
    %79 = tpu.reciprocal %78 {approx = true} : vector<8x128xf32> -> vector<8x128xf32>
    %80 = arith.mulf %76, %79 : vector<8x128xf32>
    %81 = arith.mulf %80, %8 : vector<8x128xf32>
    %82 = arith.truncf %81 : vector<8x128xf32> to vector<8x128xbf16>
    %83 = vector.extract_strided_slice %6 {offsets = [0, 512], sizes = [8, 128], strides = [1, 1]} : vector<8x1280xf32> to vector<8x128xf32>
    %84 = arith.mulf %83, %7 : vector<8x128xf32>
    %85 = arith.truncf %84 : vector<8x128xf32> to vector<8x128xbf16>
    %cst_26 = arith.constant dense<0.000000e+00> : vector<8x128xf32>
    %86 = tpu.matmul %85, %9, %cst_26 {dimension_numbers = #tpu.dot_dimension_numbers<[1], [0], [0], [1], [0, 0, 1, 1], [], []>} : vector<8x128xbf16>, vector<128x128xbf16>, vector<8x128xf32> -> vector<8x128xf32>
    %c16_i32_27 = arith.constant 16 : i32
    %87 = tpu.dynamic_rotate %86 by %c16_i32_27 dim 1 : vector<8x128xf32>, i32 -> vector<8x128xf32>
    %88 = arith.maximumf %86, %87 : vector<8x128xf32>
    %c32_i32_28 = arith.constant 32 : i32
    %89 = tpu.dynamic_rotate %88 by %c32_i32_28 dim 1 : vector<8x128xf32>, i32 -> vector<8x128xf32>
    %90 = arith.maximumf %88, %89 : vector<8x128xf32>
    %c64_i32_29 = arith.constant 64 : i32
    %91 = tpu.dynamic_rotate %90 by %c64_i32_29 dim 1 : vector<8x128xf32>, i32 -> vector<8x128xf32>
    %92 = arith.maximumf %90, %91 : vector<8x128xf32>
    %93 = arith.subf %86, %92 : vector<8x128xf32>
    %94 = math.exp %93 : vector<8x128xf32>
    %95 = arith.truncf %94 : vector<8x128xf32> to vector<8x128xbf16>
    %cst_30 = arith.constant dense<0.000000e+00> : vector<8x128xf32>
    %96 = tpu.matmul %95, %10, %cst_30 {dimension_numbers = #tpu.dot_dimension_numbers<[1], [0], [0], [1], [0, 0, 1, 1], [], []>} : vector<8x128xbf16>, vector<128x128xbf16>, vector<8x128xf32> -> vector<8x128xf32>
    %97 = tpu.reciprocal %96 {approx = true} : vector<8x128xf32> -> vector<8x128xf32>
    %98 = arith.mulf %94, %97 : vector<8x128xf32>
    %99 = arith.mulf %98, %8 : vector<8x128xf32>
    %100 = arith.truncf %99 : vector<8x128xf32> to vector<8x128xbf16>
    %101 = vector.extract_strided_slice %6 {offsets = [0, 640], sizes = [8, 128], strides = [1, 1]} : vector<8x1280xf32> to vector<8x128xf32>
    %102 = arith.mulf %101, %7 : vector<8x128xf32>
    %103 = arith.truncf %102 : vector<8x128xf32> to vector<8x128xbf16>
    %cst_31 = arith.constant dense<0.000000e+00> : vector<8x128xf32>
    %104 = tpu.matmul %103, %9, %cst_31 {dimension_numbers = #tpu.dot_dimension_numbers<[1], [0], [0], [1], [0, 0, 1, 1], [], []>} : vector<8x128xbf16>, vector<128x128xbf16>, vector<8x128xf32> -> vector<8x128xf32>
    %c16_i32_32 = arith.constant 16 : i32
    %105 = tpu.dynamic_rotate %104 by %c16_i32_32 dim 1 : vector<8x128xf32>, i32 -> vector<8x128xf32>
    %106 = arith.maximumf %104, %105 : vector<8x128xf32>
    %c32_i32_33 = arith.constant 32 : i32
    %107 = tpu.dynamic_rotate %106 by %c32_i32_33 dim 1 : vector<8x128xf32>, i32 -> vector<8x128xf32>
    %108 = arith.maximumf %106, %107 : vector<8x128xf32>
    %c64_i32_34 = arith.constant 64 : i32
    %109 = tpu.dynamic_rotate %108 by %c64_i32_34 dim 1 : vector<8x128xf32>, i32 -> vector<8x128xf32>
    %110 = arith.maximumf %108, %109 : vector<8x128xf32>
    %111 = arith.subf %104, %110 : vector<8x128xf32>
    %112 = math.exp %111 : vector<8x128xf32>
    %113 = arith.truncf %112 : vector<8x128xf32> to vector<8x128xbf16>
    %cst_35 = arith.constant dense<0.000000e+00> : vector<8x128xf32>
    %114 = tpu.matmul %113, %10, %cst_35 {dimension_numbers = #tpu.dot_dimension_numbers<[1], [0], [0], [1], [0, 0, 1, 1], [], []>} : vector<8x128xbf16>, vector<128x128xbf16>, vector<8x128xf32> -> vector<8x128xf32>
    %115 = tpu.reciprocal %114 {approx = true} : vector<8x128xf32> -> vector<8x128xf32>
    %116 = arith.mulf %112, %115 : vector<8x128xf32>
    %117 = arith.mulf %116, %8 : vector<8x128xf32>
    %118 = arith.truncf %117 : vector<8x128xf32> to vector<8x128xbf16>
    %119 = vector.extract_strided_slice %6 {offsets = [0, 768], sizes = [8, 128], strides = [1, 1]} : vector<8x1280xf32> to vector<8x128xf32>
    %120 = arith.mulf %119, %7 : vector<8x128xf32>
    %121 = arith.truncf %120 : vector<8x128xf32> to vector<8x128xbf16>
    %cst_36 = arith.constant dense<0.000000e+00> : vector<8x128xf32>
    %122 = tpu.matmul %121, %9, %cst_36 {dimension_numbers = #tpu.dot_dimension_numbers<[1], [0], [0], [1], [0, 0, 1, 1], [], []>} : vector<8x128xbf16>, vector<128x128xbf16>, vector<8x128xf32> -> vector<8x128xf32>
    %c16_i32_37 = arith.constant 16 : i32
    %123 = tpu.dynamic_rotate %122 by %c16_i32_37 dim 1 : vector<8x128xf32>, i32 -> vector<8x128xf32>
    %124 = arith.maximumf %122, %123 : vector<8x128xf32>
    %c32_i32_38 = arith.constant 32 : i32
    %125 = tpu.dynamic_rotate %124 by %c32_i32_38 dim 1 : vector<8x128xf32>, i32 -> vector<8x128xf32>
    %126 = arith.maximumf %124, %125 : vector<8x128xf32>
    %c64_i32_39 = arith.constant 64 : i32
    %127 = tpu.dynamic_rotate %126 by %c64_i32_39 dim 1 : vector<8x128xf32>, i32 -> vector<8x128xf32>
    %128 = arith.maximumf %126, %127 : vector<8x128xf32>
    %129 = arith.subf %122, %128 : vector<8x128xf32>
    %130 = math.exp %129 : vector<8x128xf32>
    %131 = arith.truncf %130 : vector<8x128xf32> to vector<8x128xbf16>
    %cst_40 = arith.constant dense<0.000000e+00> : vector<8x128xf32>
    %132 = tpu.matmul %131, %10, %cst_40 {dimension_numbers = #tpu.dot_dimension_numbers<[1], [0], [0], [1], [0, 0, 1, 1], [], []>} : vector<8x128xbf16>, vector<128x128xbf16>, vector<8x128xf32> -> vector<8x128xf32>
    %133 = tpu.reciprocal %132 {approx = true} : vector<8x128xf32> -> vector<8x128xf32>
    %134 = arith.mulf %130, %133 : vector<8x128xf32>
    %135 = arith.mulf %134, %8 : vector<8x128xf32>
    %136 = arith.truncf %135 : vector<8x128xf32> to vector<8x128xbf16>
    %137 = vector.extract_strided_slice %6 {offsets = [0, 896], sizes = [8, 128], strides = [1, 1]} : vector<8x1280xf32> to vector<8x128xf32>
    %138 = arith.mulf %137, %7 : vector<8x128xf32>
    %139 = arith.truncf %138 : vector<8x128xf32> to vector<8x128xbf16>
    %cst_41 = arith.constant dense<0.000000e+00> : vector<8x128xf32>
    %140 = tpu.matmul %139, %9, %cst_41 {dimension_numbers = #tpu.dot_dimension_numbers<[1], [0], [0], [1], [0, 0, 1, 1], [], []>} : vector<8x128xbf16>, vector<128x128xbf16>, vector<8x128xf32> -> vector<8x128xf32>
    %c16_i32_42 = arith.constant 16 : i32
    %141 = tpu.dynamic_rotate %140 by %c16_i32_42 dim 1 : vector<8x128xf32>, i32 -> vector<8x128xf32>
    %142 = arith.maximumf %140, %141 : vector<8x128xf32>
    %c32_i32_43 = arith.constant 32 : i32
    %143 = tpu.dynamic_rotate %142 by %c32_i32_43 dim 1 : vector<8x128xf32>, i32 -> vector<8x128xf32>
    %144 = arith.maximumf %142, %143 : vector<8x128xf32>
    %c64_i32_44 = arith.constant 64 : i32
    %145 = tpu.dynamic_rotate %144 by %c64_i32_44 dim 1 : vector<8x128xf32>, i32 -> vector<8x128xf32>
    %146 = arith.maximumf %144, %145 : vector<8x128xf32>
    %147 = arith.subf %140, %146 : vector<8x128xf32>
    %148 = math.exp %147 : vector<8x128xf32>
    %149 = arith.truncf %148 : vector<8x128xf32> to vector<8x128xbf16>
    %cst_45 = arith.constant dense<0.000000e+00> : vector<8x128xf32>
    %150 = tpu.matmul %149, %10, %cst_45 {dimension_numbers = #tpu.dot_dimension_numbers<[1], [0], [0], [1], [0, 0, 1, 1], [], []>} : vector<8x128xbf16>, vector<128x128xbf16>, vector<8x128xf32> -> vector<8x128xf32>
    %151 = tpu.reciprocal %150 {approx = true} : vector<8x128xf32> -> vector<8x128xf32>
    %152 = arith.mulf %148, %151 : vector<8x128xf32>
    %153 = arith.mulf %152, %8 : vector<8x128xf32>
    %154 = arith.truncf %153 : vector<8x128xf32> to vector<8x128xbf16>
    %155 = tpu.concatenate %28, %46, %64, %82, %100, %118, %136, %154 in 1 : vector<8x128xbf16>, vector<8x128xbf16>, vector<8x128xbf16>, vector<8x128xbf16>, vector<8x128xbf16>, vector<8x128xbf16>, vector<8x128xbf16>, vector<8x128xbf16> -> vector<8x1024xbf16>
    %c0_46 = arith.constant 0 : index
    %c0_47 = arith.constant 0 : index
    %156 = vector.load %arg6[%c0_46, %c0_47] : memref<1024x128xbf16, #tpu.memory_space<vmem>>, vector<1024x128xbf16>
    %cst_48 = arith.constant dense<0.000000e+00> : vector<8x128xf32>
    %157 = tpu.matmul %155, %156, %cst_48 {dimension_numbers = #tpu.dot_dimension_numbers<[1], [0], [0], [1], [0, 0, 1, 1], [], []>} : vector<8x1024xbf16>, vector<1024x128xbf16>, vector<8x128xf32> -> vector<8x128xf32>
    %c0_49 = arith.constant 0 : index
    %c0_50 = arith.constant 0 : index
    %158 = vector.load %arg7[%c0_49, %c0_50] : memref<1x128xf32, #tpu.memory_space<vmem>>, vector<1x128xf32>
    %159 = vector.broadcast %158 : vector<1x128xf32> to vector<8x128xf32>
    %160 = arith.addf %157, %159 : vector<8x128xf32>
    %c0_51 = arith.constant 0 : index
    %c0_52 = arith.constant 0 : index
    %161 = vector.load %arg8[%c0_51, %c0_52] : memref<8x128xf32, #tpu.memory_space<vmem>>, vector<8x128xf32>
    tpu.vector_store %arg8[%c0_51, %c0_52], %160 {strides = array<i32>} : memref<8x128xf32, #tpu.memory_space<vmem>>, vector<8x128xf32>,
    return
  }
  func.func @transform_0(%arg0: i32) -> (i32, i32) {
    %c0_i32 = arith.constant 0 : i32
    %c0_i32_0 = arith.constant 0 : i32
    return %arg0, %c0_i32 : i32, i32
  }
  func.func @transform_1(%arg0: i32) -> (i32, i32) {
    %c0_i32 = arith.constant 0 : i32
    %c0_i32_0 = arith.constant 0 : i32
    %c0_i32_1 = arith.constant 0 : i32
    return %c0_i32, %c0_i32_0 : i32, i32
  }
  func.func @transform_2(%arg0: i32) -> (i32, i32) {
    %c0_i32 = arith.constant 0 : i32
    %c0_i32_0 = arith.constant 0 : i32
    %c0_i32_1 = arith.constant 0 : i32
    return %c0_i32, %c0_i32_0 : i32, i32
  }
  func.func @transform_3(%arg0: i32) -> (i32, i32) {
    %c0_i32 = arith.constant 0 : i32
    %c0_i32_0 = arith.constant 0 : i32
    %c0_i32_1 = arith.constant 0 : i32
    return %c0_i32, %c0_i32_0 : i32, i32
  }
  func.func @transform_4(%arg0: i32) -> (i32, i32) {
    %c0_i32 = arith.constant 0 : i32
    %c0_i32_0 = arith.constant 0 : i32
    %c0_i32_1 = arith.constant 0 : i32
    return %c0_i32, %c0_i32_0 : i32, i32
  }
  func.func @transform_5(%arg0: i32) -> (i32, i32) {
    %c0_i32 = arith.constant 0 : i32
    %c0_i32_0 = arith.constant 0 : i32
    %c0_i32_1 = arith.constant 0 : i32
    return %c0_i32, %c0_i32_0 : i32, i32
  }
  func.func @transform_6(%arg0: i32) -> (i32, i32) {
    %c0_i32 = arith.constant 0 : i32
    %c0_i32_0 = arith.constant 0 : i32
    %c0_i32_1 = arith.constant 0 : i32
    return %c0_i32, %c0_i32_0 : i32, i32
  }
  func.func @transform_7(%arg0: i32) -> (i32, i32) {
    %c0_i32 = arith.constant 0 : i32
    %c0_i32_0 = arith.constant 0 : i32
    return %arg0, %c0_i32 : i32, i32
  }
}

</mosaic_0001>

<bundles_post_ra>
// kernel: tpu_custom_call.1
= control target key start
LH: loop header
LB: loop body
LE: loop exit
PB: predicated region body
PF: predicated region fallthrough
CT: control target
= control target key end

     0   :  { %12 = vsyncpa [#allocation3], 0  ;;  %s4258_s0 = inlined_call_operand.hbm [shape: f32[8,128], index: 0, kind: input, shape index: {}]   ;;  %s4259_s1 = inlined_call_operand.hbm [shape: bf16[128,1280], index: 1, kind: input, shape index: {}]   ;;  %s4260_s2 = inlined_call_operand.hbm [shape: f32[1,1280], index: 2, kind: input, shape index: {}]   ;;  %s4261_s3 = inlined_call_operand.hbm [shape: bf16[128,128], index: 3, kind: input, shape index: {}]   ;;  %s4262_s4 = inlined_call_operand.hbm [shape: bf16[128,128], index: 4, kind: input, shape index: {}]   ;;  %s4263_s5 = inlined_call_operand.hbm [shape: bf16[1024,128], index: 5, kind: input, shape index: {}]   ;;  %s4264_s6 = inlined_call_operand.vmem [shape: f32[1,128], index: 6, kind: input, shape index: {}]   ;;  %s4265_s7 = inlined_call_operand.hbm [shape: f32[8,128], index: 7, kind: output, shape index: {}]  }
   0x1   :  { %13 = vsyncpa [#allocation6], 0 }
   0x2   :  { %14 = vsyncpa [#allocation9], 0 }
   0x3   :  { %15 = vsyncpa [#allocation12], 0 }
   0x4   :  { %16 = vsyncpa [#allocation4], 0  ;;  %s3590_s24 = smov [#allocation5]   ;;  %s3426_s28 = scalar_lea.hbm %s4259_s1, 10240 }
   0x5   :  { %s32_s25 = sshll.u32 %s3590_s24, 4  ;;  %p3427_p0 = scmp.ne.s32.totalorder %s4259_s1, %s3426_s28  ;;  %s33_s25 = int_to_ptr.vmem [resolvable:$true] %s32_s25 }
   0x6   :  { %p3430_p1 = scmp.lt.u32.totalorder %s3426_s28, %s4259_s1 }
   0x8   :  { %p3432_p2 = pnand %p3430_p1, %p3427_p0 }
   0xa   :  { %3435 = shalt.err (!%p3432_p2)
}
   0xb   :  { %s3436_s10 = scalar_lea.vmem %s33_s25, 10240  ;;  %p3441_p4 = scmp.lt.s32.totalorder %s33_s25, %s33_s25 }
   0xc   :  { %p3437_p3 = scmp.ne.s32.totalorder %s33_s25, %s3436_s10  ;;  %p3442_p5 = scmp.lt.s32.totalorder %s3436_s10, %s3436_s10 }
   0xe   :  { %p3443_p6 = por %p3442_p5, %p3441_p4 }
  0x10   :  { %p3444_p7 = pnand %p3443_p6, %p3437_p3 }
  0x12   :  { %3447 = shalt.err (!%p3444_p7)
}
  0x13   :  { %s3591_s11 = smov 640   ;;  %s3592_s12 = smov 40  }
  0x14   :  { %38 = dma.hbm_to_vmem [thread:$0]  %s4259_s1, 10240, %s33_s25, [#allocation6], %s3591_s11, %s3591_s11, %s3592_s12  }
  0x15   :  { %s3593_s15 = smov [#allocation8]   ;;  %s3448_s19 = scalar_lea.hbm %s4261_s3, 1024 }
  0x16   :  { %s54_s16 = sshll.u32 %s3593_s15, 4  ;;  %p3449_p8 = scmp.ne.s32.totalorder %s4261_s3, %s3448_s19  ;;  %s55_s16 = int_to_ptr.vmem [resolvable:$true] %s54_s16 }
  0x17   :  { %p3452_p9 = scmp.lt.u32.totalorder %s3448_s19, %s4261_s3 }
  0x19   :  { %p3454_p10 = pnand %p3452_p9, %p3449_p8 }
  0x1b   :  { %3457 = shalt.err (!%p3454_p10)
}
  0x1c   :  { %s3458_s24 = scalar_lea.vmem %s55_s16, 1024  ;;  %p3463_p12 = scmp.lt.s32.totalorder %s55_s16, %s55_s16 }
  0x1d   :  { %p3459_p11 = scmp.ne.s32.totalorder %s55_s16, %s3458_s24  ;;  %p3464_p13 = scmp.lt.s32.totalorder %s3458_s24, %s3458_s24 }
  0x1f   :  { %p3465_p0 = por %p3464_p13, %p3463_p12 }
  0x21   :  { %p3466_p1 = pnand %p3465_p0, %p3459_p11 }
  0x23   :  { %3469 = shalt.err (!%p3466_p1)
}
  0x24   :  { %s3594_s1 = smov 64   ;;  %s3595_s25 = smov 4  }
  0x25   :  { %60 = dma.hbm_to_vmem [thread:$0]  %s4261_s3, 1024, %s55_s16, [#allocation9], %s3594_s1, %s3594_s1, %s3595_s25  }
  0x26   :  { %s3596_s28 = smov [#allocation2]   ;;  %s3597_s30 = smov [#allocation7]  }
  0x27   :  { %s23_s29 = sshll.u32 %s3596_s28, 4  ;;  %s45_s8 = sshll.u32 %s3597_s30, 4  ;;  %s24_s29 = int_to_ptr.vmem [resolvable:$true] %s23_s29  ;;  %s46_s8 = int_to_ptr.vmem [resolvable:$true] %s45_s8 }
  0x28   :  { %s3470_s11 = scalar_lea.hbm %s4258_s0, 128 }
  0x29   :  { %p3471_p2 = scmp.ne.s32.totalorder %s4258_s0, %s3470_s11  ;;  %p3474_p3 = scmp.lt.u32.totalorder %s3470_s11, %s4258_s0 }
  0x2b   :  { %p3476_p4 = pnand %p3474_p3, %p3471_p2 }
  0x2d   :  { %3479 = shalt.err (!%p3476_p4)
}
  0x2e   :  { %s3480_s3 = scalar_lea.vmem %s24_s29, 128  ;;  %p3485_p6 = scmp.lt.s32.totalorder %s24_s29, %s24_s29 }
  0x2f   :  { %p3481_p5 = scmp.ne.s32.totalorder %s24_s29, %s3480_s3  ;;  %p3486_p7 = scmp.lt.s32.totalorder %s3480_s3, %s3480_s3 }
  0x31   :  { %p3487_p8 = por %p3486_p7, %p3485_p6 }
  0x33   :  { %p3488_p9 = pnand %p3487_p8, %p3481_p5 }
  0x35   :  { %3491 = shalt.err (!%p3488_p9)
}
  0x36   :  { %26 = dma.hbm_to_vmem [thread:$0]  %s4258_s0, 128, %s24_s29, [#allocation3]  }
  0x37   :  { %s3492_s20 = scalar_lea.hbm %s4260_s2, 160 }
  0x38   :  { %p3493_p10 = scmp.ne.s32.totalorder %s4260_s2, %s3492_s20  ;;  %p3496_p11 = scmp.lt.u32.totalorder %s3492_s20, %s4260_s2 }
  0x3a   :  { %p3498_p12 = pnand %p3496_p11, %p3493_p10 }
  0x3c   :  { %3501 = shalt.err (!%p3498_p12)
}
  0x3d   :  { %s3502_s26 = scalar_lea.vmem %s46_s8, 160  ;;  %p3507_p0 = scmp.lt.s32.totalorder %s46_s8, %s46_s8 }
  0x3e   :  { %p3503_p13 = scmp.ne.s32.totalorder %s46_s8, %s3502_s26  ;;  %p3508_p1 = scmp.lt.s32.totalorder %s3502_s26, %s3502_s26 }
  0x40   :  { %p3509_p2 = por %p3508_p1, %p3507_p0 }
  0x42   :  { %p3510_p3 = pnand %p3509_p2, %p3503_p13 }
  0x44   :  { %3513 = shalt.err (!%p3510_p3)
}
  0x45   :  { %48 = dma.hbm_to_vmem [thread:$0]  %s4260_s2, 160, %s46_s8, [#allocation6]  }
  0x46   :  { %s3598_s28 = smov [#allocation10]   ;;  %s3599_s30 = smov [#allocation11]  }
  0x47   :  { %s66_s29 = sshll.u32 %s3598_s28, 4  ;;  %s78_s9 = sshll.u32 %s3599_s30, 4  ;;  %s67_s29 = int_to_ptr.vmem [resolvable:$true] %s66_s29  ;;  %s3697_s9 = int_to_ptr.vmem [resolvable:$true] %s78_s9 }
  0x48   :  { %s3514_s12 = scalar_lea.hbm %s4262_s4, 1024 }
  0x49   :  { %p3515_p4 = scmp.ne.s32.totalorder %s4262_s4, %s3514_s12  ;;  %p3518_p5 = scmp.lt.u32.totalorder %s3514_s12, %s4262_s4 }
  0x4b   :  { %p3520_p6 = pnand %p3518_p5, %p3515_p4 }
  0x4d   :  { %3523 = shalt.err (!%p3520_p6)
}
  0x4e   :  { %s3524_s2 = scalar_lea.vmem %s67_s29, 1024  ;;  %p3529_p8 = scmp.lt.s32.totalorder %s67_s29, %s67_s29 }
  0x4f   :  { %p3525_p7 = scmp.ne.s32.totalorder %s67_s29, %s3524_s2  ;;  %p3530_p9 = scmp.lt.s32.totalorder %s3524_s2, %s3524_s2 }
  0x51   :  { %p3531_p10 = por %p3530_p9, %p3529_p8 }
  0x53   :  { %p3532_p11 = pnand %p3531_p10, %p3525_p7 }
  0x55   :  { %3535 = shalt.err (!%p3532_p11)
}
  0x56   :  { %72 = dma.hbm_to_vmem [thread:$0]  %s4262_s4, 1024, %s67_s29, [#allocation9], %s3594_s1, %s3594_s1, %s3595_s25  }
  0x57   :  { %s3536_s19 = scalar_lea.hbm %s4263_s5, 8192 }
  0x58   :  { %p3537_p12 = scmp.ne.s32.totalorder %s4263_s5, %s3536_s19  ;;  %p3540_p13 = scmp.lt.u32.totalorder %s3536_s19, %s4263_s5 }
  0x5a   :  { %p3542_p0 = pnand %p3540_p13, %p3537_p12 }
  0x5c   :  { %3545 = shalt.err (!%p3542_p0)
}
  0x5d   :  { %s3546_s24 = scalar_lea.vmem %s3697_s9, 8192  ;;  %p3551_p2 = scmp.lt.s32.totalorder %s3697_s9, %s3697_s9 }
  0x5e   :  { %p3547_p1 = scmp.ne.s32.totalorder %s3697_s9, %s3546_s24  ;;  %p3552_p3 = scmp.lt.s32.totalorder %s3546_s24, %s3546_s24 }
  0x60   :  { %p3553_p4 = por %p3552_p3, %p3551_p2 }
  0x62   :  { %p3554_p5 = pnand %p3553_p4, %p3547_p1 }
  0x64   :  { %3557 = shalt.err (!%p3554_p5)
}
  0x65   :  { %84 = dma.hbm_to_vmem [thread:$0]  %s4263_s5, 8192, %s3697_s9, [#allocation12], %s3594_s1, %s3594_s1, %s3595_s25  }
  0x66   :  { %3580 = dma.done.wait [#allocation3], 128  }
  0x67   :  { %3581 = vsyncadd [#allocation3], 4294967168 }
  0x68   :  { %3582 = dma.done.wait [#allocation6], 10400  }
  0x69   :  { %3583 = vsyncadd [#allocation6], 4294956896 }
  0x6a   :  { %3584 = dma.done.wait [#allocation9], 2048  }
  0x6b   :  { %3585 = vsyncadd [#allocation9], 4294965248 }
  0x6c   :  { %3586 = dma.done.wait [#allocation12], 8192  }
  0x6d   :  { %3587 = vsyncadd [#allocation12], 4294959104  ;;  %v3600_v0 = vmov 0   ;;  %v3194_v1 = vld [vmem:[#allocation5 + $0x4] ss:$40 sps:$4 sm:$0xff]   ;;  %v106_v26 = vld [vmem:[#allocation2] sm:$0xff] }
  0x6e   :  { %674 = vmatprep.mubr.bf16.mxu0 %v3600_v0  ;;  %715 = vmatprep.mubr.bf16.mxu1 %v3600_v0  ;;  %v3196_v2 = vld [vmem:[#allocation5] ss:$40 sps:$4 sm:$0xff]   ;;  %v3197_v3 = vld [vmem:[#allocation5 + $0x54] ss:$40 sps:$4 sm:$0xff]   ;;  %v3199_v4 = vld [vmem:[#allocation5 + $0x50] ss:$40 sps:$4 sm:$0xff]   ;;  %v3736_v30 = vpack.c.bf16 %v106_v26, %v106_v26  ;;  %v192_v26 = vlaneseq }
  0x6f   :  { %642 = vmatprep.subr.bf16.mxu0 %v3194_v1  ;;  %v3200_v5 = vld [vmem:[#allocation5 + $0xa4] ss:$40 sps:$4 sm:$0xff]   ;;  %v3202_v6 = vld [vmem:[#allocation5 + $0xa0] ss:$40 sps:$4 sm:$0xff]   ;;  %v3203_v7 = vld [vmem:[#allocation5 + $0xf4] ss:$40 sps:$4 sm:$0xff]  }
  0x70   :  { %643 = vmatpush1.bf16.msra.mxu0 %v3196_v2  ;;  %v3205_v8 = vld [vmem:[#allocation5 + $0xf0] ss:$40 sps:$4 sm:$0xff]   ;;  %v3206_v9 = vld [vmem:[#allocation5 + $0x144] ss:$40 sps:$4 sm:$0xff]   ;;  %v3208_v14 = vld [vmem:[#allocation5 + $0x140] ss:$40 sps:$4 sm:$0xff]  }
  0x71   :  { %644 = vmatprep.subr.bf16.mxu0 %v3197_v3  ;;  %v3218_v10 = vld [vmem:[#allocation5 + $0xc] ss:$40 sps:$4 sm:$0xff]   ;;  %v3220_v11 = vld [vmem:[#allocation5 + $0x8] ss:$40 sps:$4 sm:$0xff]   ;;  %v3224_v12 = vld [vmem:[#allocation5 + $0x5c] ss:$40 sps:$4 sm:$0xff]  }
  0x72   :  { %683 = vmatprep.subr.bf16.mxu1 %v3218_v10  ;;  %v3226_v13 = vld [vmem:[#allocation5 + $0x58] ss:$40 sps:$4 sm:$0xff]   ;;  %v3209_v15 = vld [vmem:[#allocation5 + $0x194] ss:$40 sps:$4 sm:$0xff]   ;;  %v3232_v18 = vld [vmem:[#allocation5 + $0xa8] ss:$40 sps:$4 sm:$0xff]  }
  0x73   :  { %684 = vmatpush1.bf16.msra.mxu1 %v3220_v11  ;;  %v3230_v16 = vld [vmem:[#allocation5 + $0xac] ss:$40 sps:$4 sm:$0xff]   ;;  %v3211_v17 = vld [vmem:[#allocation5 + $0x190] ss:$40 sps:$4 sm:$0xff]   ;;  %v3236_v19 = vld [vmem:[#allocation5 + $0xfc] ss:$40 sps:$4 sm:$0xff]  }
  0x74   :  { %645 = vmatpush1.bf16.msra.mxu0 %v3199_v4  ;;  %685 = vmatprep.subr.bf16.mxu1 %v3224_v12  ;;  %v3212_v20 = vld [vmem:[#allocation5 + $0x1e4] ss:$40 sps:$4 sm:$0xff]   ;;  %v3214_v21 = vld [vmem:[#allocation5 + $0x1e0] ss:$40 sps:$4 sm:$0xff]   ;;  %v3215_v24 = vld [vmem:[#allocation5 + $0x234] ss:$40 sps:$4 sm:$0xff]  }
  0x75   :  { %646 = vmatprep.subr.bf16.mxu0 %v3200_v5  ;;  %v3238_v22 = vld [vmem:[#allocation5 + $0xf8] ss:$40 sps:$4 sm:$0xff]   ;;  %v3242_v23 = vld [vmem:[#allocation5 + $0x14c] ss:$40 sps:$4 sm:$0xff]   ;;  %v3244_v27 = vld [vmem:[#allocation5 + $0x148] ss:$40 sps:$4 sm:$0xff]  }
  0x76   :  { %v3217_v25 = vld [vmem:[#allocation5 + $0x230] ss:$40 sps:$4 sm:$0xff]   ;;  %v3248_v28 = vld [vmem:[#allocation5 + $0x19c] ss:$40 sps:$4 sm:$0xff]   ;;  %v3254_v33 = vld [vmem:[#allocation5 + $0x1ec] ss:$40 sps:$4 sm:$0xff]  }
  0x77   :  { %686 = vmatpush1.bf16.msra.mxu1 %v3226_v13  ;;  %v3223_v29 = vld [vmem:[#allocation5 + $0x14] ss:$40 sps:$4 sm:$0xff]   ;;  %v3221_v31 = vld [vmem:[#allocation5 + $0x10] ss:$40 sps:$4 sm:$0xff]   ;;  %v3229_v34 = vld [vmem:[#allocation5 + $0x64] ss:$40 sps:$4 sm:$0xff]  }
  0x78   :  { %647 = vmatpush1.bf16.msra.mxu0 %v3202_v6  ;;  %687 = vmatprep.subr.bf16.mxu1 %v3230_v16  ;;  %v3250_v32 = vld [vmem:[#allocation5 + $0x198] ss:$40 sps:$4 sm:$0xff]   ;;  %v3256_v36 = vld [vmem:[#allocation5 + $0x1e8] ss:$40 sps:$4 sm:$0xff]   ;;  %v3260_v37 = vld [vmem:[#allocation5 + $0x23c] ss:$40 sps:$4 sm:$0xff]  }
  0x79   :  { %648 = vmatprep.subr.bf16.mxu0 %v3203_v7  ;;  %v3227_v35 = vld [vmem:[#allocation5 + $0x60] ss:$40 sps:$4 sm:$0xff]   ;;  %v3235_v38 = vld [vmem:[#allocation5 + $0xb4] ss:$40 sps:$4 sm:$0xff]   ;;  %v3233_v39 = vld [vmem:[#allocation5 + $0xb0] ss:$40 sps:$4 sm:$0xff]  }
  0x7a   :  { %v3262_v40 = vld [vmem:[#allocation5 + $0x238] ss:$40 sps:$4 sm:$0xff]   ;;  %v3268_v41 = vld [vmem:[#allocation5 + $0x1c] ss:$40 sps:$4 sm:$0xff]   ;;  %v3274_v45 = vld [vmem:[#allocation5 + $0x6c] ss:$40 sps:$4 sm:$0xff]  }
  0x7b   :  { %688 = vmatpush1.bf16.msra.mxu1 %v3232_v18  ;;  %v3241_v42 = vld [vmem:[#allocation5 + $0x104] ss:$40 sps:$4 sm:$0xff]   ;;  %v3239_v43 = vld [vmem:[#allocation5 + $0x100] ss:$40 sps:$4 sm:$0xff]   ;;  %v3247_v46 = vld [vmem:[#allocation5 + $0x154] ss:$40 sps:$4 sm:$0xff]  }
  0x7c   :  { %649 = vmatpush1.bf16.msra.mxu0 %v3205_v8  ;;  %689 = vmatprep.subr.bf16.mxu1 %v3236_v19  ;;  %v3266_v44 = vld [vmem:[#allocation5 + $0x18] ss:$40 sps:$4 sm:$0xff]   ;;  %v3272_v48 = vld [vmem:[#allocation5 + $0x68] ss:$40 sps:$4 sm:$0xff]   ;;  %v3280_v49 = vld [vmem:[#allocation5 + $0xbc] ss:$40 sps:$4 sm:$0xff]  }
  0x7d   :  { %650 = vmatprep.subr.bf16.mxu0 %v3206_v9  ;;  %v3245_v47 = vld [vmem:[#allocation5 + $0x150] ss:$40 sps:$4 sm:$0xff]   ;;  %v3253_v50 = vld [vmem:[#allocation5 + $0x1a4] ss:$40 sps:$4 sm:$0xff]   ;;  %v3251_v51 = vld [vmem:[#allocation5 + $0x1a0] ss:$40 sps:$4 sm:$0xff]  }
  0x7e   :  { %v3278_v52 = vld [vmem:[#allocation5 + $0xb8] ss:$40 sps:$4 sm:$0xff]   ;;  %v3286_v53 = vld [vmem:[#allocation5 + $0x10c] ss:$40 sps:$4 sm:$0xff]   ;;  %v3284_v56 = vld [vmem:[#allocation5 + $0x108] ss:$40 sps:$4 sm:$0xff]  }
  0x7f   :  { %690 = vmatpush1.bf16.msra.mxu1 %v3238_v22  ;;  %v3259_v54 = vld [vmem:[#allocation5 + $0x1f4] ss:$40 sps:$4 sm:$0xff]   ;;  %v3257_v55 = vld [vmem:[#allocation5 + $0x1f0] ss:$40 sps:$4 sm:$0xff]   ;;  %v3265_v58 = vld [vmem:[#allocation5 + $0x244] ss:$40 sps:$4 sm:$0xff]  }
  0x80   :  { %651 = vmatpush1.bf16.msra.mxu0 %v3208_v14  ;;  %691 = vmatprep.subr.bf16.mxu1 %v3242_v23  ;;  %v3292_v57 = vld [vmem:[#allocation5 + $0x15c] ss:$40 sps:$4 sm:$0xff]   ;;  %v3290_v59 = vld [vmem:[#allocation5 + $0x158] ss:$40 sps:$4 sm:$0xff]   ;;  %v3298_v61 = vld [vmem:[#allocation5 + $0x1ac] ss:$40 sps:$4 sm:$0xff]  }
  0x81   :  { %652 = vmatprep.subr.bf16.mxu0 %v3209_v15  ;;  %v3263_v60 = vld [vmem:[#allocation5 + $0x240] ss:$40 sps:$4 sm:$0xff]   ;;  %v3271_v62 = vld [vmem:[#allocation5 + $0x24] ss:$40 sps:$4 sm:$0xff]   ;;  %v3277_v3 = vld [vmem:[#allocation5 + $0x74] ss:$40 sps:$4 sm:$0xff]  }
  0x82   :  { %v3296_v63 = vld [vmem:[#allocation5 + $0x1a8] ss:$40 sps:$4 sm:$0xff]   ;;  %v3304_v2 = vld [vmem:[#allocation5 + $0x1fc] ss:$40 sps:$4 sm:$0xff]   ;;  %v3302_v4 = vld [vmem:[#allocation5 + $0x1f8] ss:$40 sps:$4 sm:$0xff]  }
  0x83   :  { %692 = vmatpush1.bf16.msra.mxu1 %v3244_v27  ;;  %v3269_v1 = vld [vmem:[#allocation5 + $0x20] ss:$40 sps:$4 sm:$0xff]   ;;  %v3275_v5 = vld [vmem:[#allocation5 + $0x70] ss:$40 sps:$4 sm:$0xff]   ;;  %v3310_v6 = vld [vmem:[#allocation5 + $0x24c] ss:$40 sps:$4 sm:$0xff]  }
  0x84   :  { %653 = vmatpush1.bf16.msra.mxu0 %v3211_v17  ;;  %693 = vmatprep.subr.bf16.mxu1 %v3248_v28  ;;  %v3283_v7 = vld [vmem:[#allocation5 + $0xc4] ss:$40 sps:$4 sm:$0xff]   ;;  %v3308_v8 = vld [vmem:[#allocation5 + $0x248] ss:$40 sps:$4 sm:$0xff]   ;;  %v3289_v10 = vld [vmem:[#allocation5 + $0x114] ss:$40 sps:$4 sm:$0xff]  }
  0x85   :  { %654 = vmatprep.subr.bf16.mxu0 %v3212_v20  ;;  %v3281_v9 = vld [vmem:[#allocation5 + $0xc0] ss:$40 sps:$4 sm:$0xff]   ;;  %v3287_v11 = vld [vmem:[#allocation5 + $0x110] ss:$40 sps:$4 sm:$0xff]   ;;  %v3295_v12 = vld [vmem:[#allocation5 + $0x164] ss:$40 sps:$4 sm:$0xff]  }
  0x86   :  { %v3293_v13 = vld [vmem:[#allocation5 + $0x160] ss:$40 sps:$4 sm:$0xff]   ;;  %v3301_v14 = vld [vmem:[#allocation5 + $0x1b4] ss:$40 sps:$4 sm:$0xff]   ;;  %v3299_v15 = vld [vmem:[#allocation5 + $0x1b0] ss:$40 sps:$4 sm:$0xff]  }
  0x87   :  { %694 = vmatpush1.bf16.msra.mxu1 %v3250_v32  ;;  %v3307_v16 = vld [vmem:[#allocation5 + $0x204] ss:$40 sps:$4 sm:$0xff]   ;;  %v3313_v17 = vld [vmem:[#allocation5 + $0x254] ss:$40 sps:$4 sm:$0xff]   ;;  %v3311_v18 = vld [vmem:[#allocation5 + $0x250] ss:$40 sps:$4 sm:$0xff]  }
  0x88   :  { %655 = vmatpush1.bf16.msra.mxu0 %v3214_v21  ;;  %695 = vmatprep.subr.bf16.mxu1 %v3254_v33  ;;  %v3746_v19 = vld [vmem:[#allocation8] sm:$0xff]   ;;  %v3601_v20 = vmov 0.0   ;;  %v3751_v21 = vld [vmem:[#allocation8 + $0x8] sm:$0xff]   ;;  %v3755_v22 = vld [vmem:[#allocation8 + $0x10] sm:$0xff]   ;;  %v193_v28 = vshrl.u32 %v192_v26, 7  ;;  %vm3602_vm0 = vmmov 0  }
  0x89   :  { %656 = vmatprep.subr.bf16.mxu0 %v3215_v24  ;;  %v3759_v23 = vld [vmem:[#allocation8 + $0x18] sm:$0xff]   ;;  %v3763_v24 = vld [vmem:[#allocation8 + $0x20] sm:$0xff]   ;;  %v3771_v27 = vld [vmem:[#allocation8 + $0x30] sm:$0xff]   ;;  %s3603_s5 = smov 16   ;;  %s3604_s25 = smov 32  }
  0x8a   :  { %v3776_v32 = vld [vmem:[#allocation8 + $0x38] sm:$0xff]   ;;  %s3605_s27 = smov [#allocation13]  }
  0x8b   :  { %696 = vmatpush1.bf16.msra.mxu1 %v3256_v36  ;;  %s2453_s28 = sshll.u32 %s3605_s27, 4  ;;  %s2454_s28 = int_to_ptr.vmem [resolvable:$true] %s2453_s28 }
  0x8c   :  { %657 = vmatpush1.bf16.msra.mxu0 %v3217_v25  ;;  %697 = vmatprep.subr.bf16.mxu1 %v3260_v37  ;;  %v3767_v25 = vld [vmem:[#allocation8 + $0x28] sm:$0xff]   ;;  %p3563_p7 = scmp.lt.s32.totalorder %s2454_s28, %s2454_s28 }
  0x8d   :  { %724 = vmatprep.subr.bf16.mxu0 %v3223_v29  ;;  %v189_v29 = vld [vmem:[#allocation7 + $0x8] sm:$0x3] }
  0x8f   :  { %675 = vmatmul.mubr.bf16.vlgmr.msra.gmra.mrb[0].mxu0 %v3736_v30  ;;  %698 = vmatpush1.bf16.msra.mxu1 %v3262_v40 }
  0x90   :  { %725 = vmatpush1.bf16.msra.mxu0 %v3221_v31  ;;  %756 = vmatprep.mubr.bf16.mxu0 %v3600_v0 }
  0x91   :  { %726 = vmatprep.subr.bf16.mxu0 %v3229_v34  ;;  %765 = vmatprep.subr.bf16.mxu1 %v3268_v41 }
  0x92   :  { %716 = vmatmul.mubr.bf16.vlgmr.msra.gmra.mrb[0].mxu1 %v3736_v30 }
  0x93   :  { %766 = vmatpush1.bf16.msra.mxu1 %v3266_v44  ;;  %797 = vmatprep.mubr.bf16.mxu1 %v3600_v0 }
  0x94   :  { %727 = vmatpush1.bf16.msra.mxu0 %v3227_v35  ;;  %767 = vmatprep.subr.bf16.mxu1 %v3274_v45 }
  0x95   :  { %728 = vmatprep.subr.bf16.mxu0 %v3235_v38 }
  0x97   :  { %768 = vmatpush1.bf16.msra.mxu1 %v3272_v48 }
  0x98   :  { %729 = vmatpush1.bf16.msra.mxu0 %v3233_v39  ;;  %769 = vmatprep.subr.bf16.mxu1 %v3280_v49  ;;  %v202_v49 = vsub.s32 2, %v193_v28 }
  0x99   :  { %730 = vmatprep.subr.bf16.mxu0 %v3241_v42 }
  0x9b   :  { %770 = vmatpush1.bf16.msra.mxu1 %v3278_v52  ;;  %v222_v52 = vsub.s32 7, %v193_v28 }
  0x9c   :  { %731 = vmatpush1.bf16.msra.mxu0 %v3239_v43  ;;  %771 = vmatprep.subr.bf16.mxu1 %v3286_v53  ;;  %v194_v53 = vsub.s32 0, %v193_v28 }
  0x9d   :  { %732 = vmatprep.subr.bf16.mxu0 %v3247_v46 }
  0x9f   :  { %772 = vmatpush1.bf16.msra.mxu1 %v3284_v56  ;;  %v214_v56 = vsub.s32 5, %v193_v28 }
  0xa0   :  { %733 = vmatpush1.bf16.msra.mxu0 %v3245_v47  ;;  %773 = vmatprep.subr.bf16.mxu1 %v3292_v57 }
  0xa1   :  { %734 = vmatprep.subr.bf16.mxu0 %v3253_v50  ;;  %v206_v50 = vsub.s32 3, %v193_v28 }
  0xa3   :  { %774 = vmatpush1.bf16.msra.mxu1 %v3290_v59 }
  0xa4   :  { %735 = vmatpush1.bf16.msra.mxu0 %v3251_v51  ;;  %775 = vmatprep.subr.bf16.mxu1 %v3298_v61  ;;  %v218_v51 = vsub.s32 6, %v193_v28 }
  0xa5   :  { %736 = vmatprep.subr.bf16.mxu0 %v3259_v54  ;;  %v188_v54 = vld [vmem:[#allocation7] sm:$0xff] }
  0xa6   :  { %v203_v57 = vrot.slane %v188_v54, %v202_v49  ;;  %v219_v59 = vrot.slane %v188_v54, %v218_v51  ;;  %v195_v61 = vrot.slane %v188_v54, %v194_v53 }
  0xa7   :  { %776 = vmatpush1.bf16.msra.mxu1 %v3296_v63  ;;  %v227_v63 = vrot.slane %v189_v29, %v194_v53 }
  0xa8   :  { %737 = vmatpush1.bf16.msra.mxu0 %v3257_v55  ;;  %777 = vmatprep.subr.bf16.mxu1 %v3304_v2  ;;  %v210_v55 = vsub.s32 4, %v193_v28  ;;  %v215_v2 = vrot.slane %v188_v54, %v214_v56  ;;  %v3954_v56 = vld [vmem:[#allocation10 + $0x8] sm:$0xff]  }
  0xa9   :  { %738 = vmatprep.subr.bf16.mxu0 %v3265_v58  ;;  %v207_v58 = vrot.slane %v188_v54, %v206_v50 }
  0xab   :  { %778 = vmatpush1.bf16.msra.mxu1 %v3302_v4 }
  0xac   :  { %739 = vmatpush1.bf16.msra.mxu0 %v3263_v60  ;;  %779 = vmatprep.subr.bf16.mxu1 %v3310_v6  ;;  %v223_v60 = vrot.slane %v188_v54, %v222_v52 }
  0xad   :  { %806 = vmatprep.subr.bf16.mxu0 %v3271_v62 }
  0xaf   :  { %757 = vmatmul.mubr.bf16.vlgmr.msra.gmra.mrb[4].mxu0 %v3736_v30  ;;  %780 = vmatpush1.bf16.msra.mxu1 %v3308_v8 }
  0xb0   :  { %807 = vmatpush1.bf16.msra.mxu0 %v3269_v1  ;;  %838 = vmatprep.mubr.bf16.mxu0 %v3600_v0  ;;  %v3305_v0 = vld [vmem:[#allocation5 + $0x200] ss:$40 sps:$4 sm:$0xff]   ;;  %v211_v1 = vrot.slane %v188_v54, %v210_v55 }
  0xb1   :  { %808 = vmatprep.subr.bf16.mxu0 %v3277_v3  ;;  %2858 = vmatprep.subr.bf16.mxu1 %v3601_v20  ;;  %v3951_v55 = vld [vmem:[#allocation10] sm:$0xff]  }
  0xb2   :  { %798 = vmatmul.mubr.bf16.vlgmr.msra.gmra.mrb[4].mxu1 %v3736_v30 }
  0xb3   :  { %2859 = vmatpush3.bf16.msra.mxu1 %v3746_v19  ;;  %2874 = vmatprep.mubr.msk.bf16.mxu1 %vm3602_vm0, %v3601_v20 }
  0xb4   :  { %809 = vmatpush1.bf16.msra.mxu0 %v3275_v5  ;;  %2860 = vmatprep.subr.bf16.mxu1 %v3601_v20 }
  0xb5   :  { %810 = vmatprep.subr.bf16.mxu0 %v3283_v7 }
  0xb7   :  { %2861 = vmatpush3.bf16.msra.mxu1 %v3751_v21 }
  0xb8   :  { %811 = vmatpush1.bf16.msra.mxu0 %v3281_v9  ;;  %2862 = vmatprep.subr.bf16.mxu1 %v3601_v20 }
  0xb9   :  { %812 = vmatprep.subr.bf16.mxu0 %v3289_v10 }
  0xbb   :  { %2863 = vmatpush3.bf16.msra.mxu1 %v3755_v22 }
  0xbc   :  { %813 = vmatpush1.bf16.msra.mxu0 %v3287_v11  ;;  %2864 = vmatprep.subr.bf16.mxu1 %v3601_v20 }
  0xbd   :  { %814 = vmatprep.subr.bf16.mxu0 %v3295_v12 }
  0xbf   :  { %2865 = vmatpush3.bf16.msra.mxu1 %v3759_v23 }
  0xc0   :  { %815 = vmatpush1.bf16.msra.mxu0 %v3293_v13  ;;  %2866 = vmatprep.subr.bf16.mxu1 %v3601_v20 }
  0xc1   :  { %816 = vmatprep.subr.bf16.mxu0 %v3301_v14 }
  0xc3   :  { %2867 = vmatpush3.bf16.msra.mxu1 %v3763_v24 }
  0xc4   :  { %817 = vmatpush1.bf16.msra.mxu0 %v3299_v15  ;;  %2868 = vmatprep.subr.bf16.mxu1 %v3601_v20 }
  0xc5   :  { %818 = vmatprep.subr.bf16.mxu0 %v3307_v16 }
  0xc7   :  { %2869 = vmatpush3.bf16.msra.mxu1 %v3767_v25 }
  0xc8   :  { %819 = vmatpush1.bf16.msra.mxu0 %v3305_v0  ;;  %2870 = vmatprep.subr.bf16.mxu1 %v3601_v20 }
  0xc9   :  { %820 = vmatprep.subr.bf16.mxu0 %v3313_v17 }
  0xcb   :  { %2871 = vmatpush3.bf16.msra.mxu1 %v3771_v27 }
  0xcc   :  { %821 = vmatpush1.bf16.msra.mxu0 %v3311_v18  ;;  %2872 = vmatprep.subr.bf16.mxu1 %v3601_v20 }
  0xcd   :  { %2878 = vmatprep.subr.bf16.mxu0 %v3601_v20 }
  0xcf   :  { %839 = vmatmul.mubr.bf16.vlgmr.msra.gmra.mrb[8].mxu0 %v3736_v30  ;;  %v198_v30 = vsub.s32 1, %v193_v28  ;;  %2873 = vmatpush3.bf16.msra.mxu1 %v3776_v32 }
  0xd0   :  { %2898 = vmatprep.subr.bf16.mxu1 %v3601_v20  ;;  %2894 = vmatprep.mubr.msk.bf16.mxu0 %vm3602_vm0, %v3601_v20 }
  0xd1   :  { %v231_v31 = vrot.slane %v189_v29, %v198_v30  ;;  %v199_v62 = vrot.slane %v188_v54, %v198_v30  ;;  %2879 = vmatpush3.bf16.msra.mxu0 %v3951_v55 }
  0xd2   :  { %2880 = vmatprep.subr.bf16.mxu0 %v3601_v20 }
  0xd5   :  { %2881 = vmatpush3.bf16.msra.mxu0 %v3954_v56 }
  0xd6   :  { %2882 = vmatprep.subr.bf16.mxu0 %v3601_v20 }
 0x162   :  { %v676_v33 = vpop.f32.mrb[0].mxu0 }
 0x163   :  { %v678_v34 = vpop.f32.mrb[1].mxu0  ;;  %v677_v8 = vadd.f32 %v676_v33, %v195_v61 }
 0x164   :  { %v680_v35 = vpop.f32.mrb[2].mxu0  ;;  %v679_v9 = vadd.f32 %v678_v34, %v199_v62 }
 0x165   :  { %v681_v36 = vpop.f32.mrb[3].mxu0  ;;  %v717_v37 = vpop.f32.mrb[0].mxu1 }
 0x166   :  { %v719_v38 = vpop.f32.mrb[1].mxu1  ;;  %v718_v3 = vadd.f32 %v717_v37, %v203_v57 }
 0x167   :  { %v721_v39 = vpop.f32.mrb[2].mxu1  ;;  %v720_v4 = vadd.f32 %v719_v38, %v207_v58 }
 0x168   :  { %v722_v40 = vpop.f32.mrb[3].mxu1 }
 0x182   :  { %v758_v41 = vpop.f32.mrb[4].mxu0 }
 0x183   :  { %v760_v42 = vpop.f32.mrb[5].mxu0  ;;  %v759_v12 = vadd.f32 %v758_v41, %v211_v1 }
 0x184   :  { %v762_v43 = vpop.f32.mrb[6].mxu0  ;;  %v761_v13 = vadd.f32 %v760_v42, %v215_v2 }
 0x185   :  { %v763_v44 = vpop.f32.mrb[7].mxu0  ;;  %v799_v45 = vpop.f32.mrb[4].mxu1 }
 0x186   :  { %v801_v46 = vpop.f32.mrb[5].mxu1  ;;  %v800_v5 = vadd.f32 %v799_v45, %v219_v59  ;;  %v3959_v59 = vld [vmem:[#allocation10 + $0x10] sm:$0xff]  }
 0x187   :  { %v803_v47 = vpop.f32.mrb[6].mxu1  ;;  %v802_v6 = vadd.f32 %v801_v46, %v223_v60  ;;  %2883 = vmatpush3.bf16.msra.mxu0 %v3959_v59  ;;  %v3964_v60 = vld [vmem:[#allocation10 + $0x18] sm:$0xff]  }
 0x188   :  { %v804_v48 = vpop.f32.mrb[7].mxu1  ;;  %2884 = vmatprep.subr.bf16.mxu0 %v3601_v20 }
 0x18b   :  { %2885 = vmatpush3.bf16.msra.mxu0 %v3964_v60 }
 0x18c   :  { %2886 = vmatprep.subr.bf16.mxu0 %v3601_v20 }
 0x1a2   :  { %v840_v7 = vpop.f32.mrb[8].mxu0 }
 0x1a3   :  { %v841_v10 = vadd.f32 %v840_v7, %v227_v63  ;;  %v842_v11 = vpop.f32.mrb[9].mxu0  ;;  %v3975_v7 = vld [vmem:[#allocation10 + $0x20] sm:$0xff]  }
 0x1a4   :  { %v3784_v14 = vadd.f32 %v842_v11, %v231_v31  ;;  %v844_v15 = vpop.f32.mrb[10].mxu0  ;;  %2887 = vmatpush3.bf16.msra.mxu0 %v3975_v7  ;;  %v3979_v11 = vld [vmem:[#allocation10 + $0x28] sm:$0xff]  }
 0x1a5   :  { %v845_v16 = vpop.f32.mrb[11].mxu0  ;;  %v879_v0 = vmul.f32 %v841_v10, %v677_v8  ;;  %v1074_v17 = vmul.f32 %v841_v10, %v679_v9  ;;  %v1173_v18 = vmul.f32 %v841_v10, %v718_v3  ;;  %v3786_v26 = vmul.f32 %v841_v10, %v720_v4  ;;  %2888 = vmatprep.subr.bf16.mxu0 %v3601_v20 }
 0x1a6   :  { %v3788_v28 = vmul.f32 %v841_v10, %v759_v12  ;;  %v3790_v29 = vmul.f32 %v841_v10, %v761_v13  ;;  %v3792_v30 = vmul.f32 %v841_v10, %v800_v5  ;;  %v3794_v33 = vmul.f32 %v841_v10, %v802_v6  ;;  %v3983_v13 = vld [vmem:[#allocation10 + $0x30] sm:$0xff]  }
 0x1a7   :  { %v880_v34 = vpack.c.bf16 %v879_v0, %v879_v0  ;;  %v1075_v31 = vpack.c.bf16 %v1074_v17, %v1074_v17  ;;  %v1174_v35 = vpack.c.bf16 %v1173_v18, %v1173_v18  ;;  %v1273_v36 = vpack.c.bf16 %v3786_v26, %v3786_v26  ;;  %v3988_v0 = vld [vmem:[#allocation10 + $0x38] sm:$0xff]  }
 0x1a8   :  { %v1372_v37 = vpack.c.bf16 %v3788_v28, %v3788_v28  ;;  %v1471_v38 = vpack.c.bf16 %v3790_v29, %v3790_v29  ;;  %v1570_v39 = vpack.c.bf16 %v3792_v30, %v3792_v30  ;;  %2889 = vmatpush3.bf16.msra.mxu0 %v3979_v11 }
 0x1a9   :  { %2875 = vmatmul.mubr.bf16.vlgmr.msra.gmra.mrb[8].mxu1 %v880_v34  ;;  %2890 = vmatprep.subr.bf16.mxu0 %v3601_v20 }
 0x1aa   :  { %2899 = vmatpush3.bf16.msra.mxu1 %v3746_v19  ;;  %2914 = vmatprep.mubr.msk.bf16.mxu1 %vm3602_vm0, %v3601_v20 }
 0x1ab   :  { %2900 = vmatprep.subr.bf16.mxu1 %v3601_v20 }
 0x1ac   :  { %2891 = vmatpush3.bf16.msra.mxu0 %v3983_v13 }
 0x1ad   :  { %2892 = vmatprep.subr.bf16.mxu0 %v3601_v20 }
 0x1ae   :  { %2901 = vmatpush3.bf16.msra.mxu1 %v3751_v21 }
 0x1af   :  { %2902 = vmatprep.subr.bf16.mxu1 %v3601_v20 }
 0x1b0   :  { %2893 = vmatpush3.bf16.msra.mxu0 %v3988_v0 }
 0x1b1   :  { %2918 = vmatprep.subr.bf16.mxu0 %v3601_v20 }
 0x1b2   :  { %2903 = vmatpush3.bf16.msra.mxu1 %v3755_v22 }
 0x1b3   :  { %2904 = vmatprep.subr.bf16.mxu1 %v3601_v20 }
 0x1b6   :  { %2905 = vmatpush3.bf16.msra.mxu1 %v3759_v23 }
 0x1b7   :  { %2906 = vmatprep.subr.bf16.mxu1 %v3601_v20 }
 0x1ba   :  { %2907 = vmatpush3.bf16.msra.mxu1 %v3763_v24 }
 0x1bb   :  { %2908 = vmatprep.subr.bf16.mxu1 %v3601_v20 }
 0x1be   :  { %2909 = vmatpush3.bf16.msra.mxu1 %v3767_v25 }
 0x1bf   :  { %2910 = vmatprep.subr.bf16.mxu1 %v3601_v20 }
 0x1c2   :  { %2911 = vmatpush3.bf16.msra.mxu1 %v3771_v27 }
 0x1c3   :  { %2912 = vmatprep.subr.bf16.mxu1 %v3601_v20 }
 0x1c6   :  { %2913 = vmatpush3.bf16.msra.mxu1 %v3776_v32 }
 0x1c7   :  { %2938 = vmatprep.subr.bf16.mxu1 %v3601_v20 }
 0x1c9   :  { %2915 = vmatmul.mubr.bf16.vlgmr.msra.gmra.mrb[12].mxu1 %v1075_v31 }
 0x1ca   :  { %2939 = vmatpush3.bf16.msra.mxu1 %v3746_v19  ;;  %2954 = vmatprep.mubr.msk.bf16.mxu1 %vm3602_vm0, %v3601_v20 }
 0x1cb   :  { %2940 = vmatprep.subr.bf16.mxu1 %v3601_v20 }
 0x1ce   :  { %2941 = vmatpush3.bf16.msra.mxu1 %v3751_v21 }
 0x1cf   :  { %2942 = vmatprep.subr.bf16.mxu1 %v3601_v20 }
 0x1d2   :  { %2943 = vmatpush3.bf16.msra.mxu1 %v3755_v22 }
 0x1d3   :  { %2944 = vmatprep.subr.bf16.mxu1 %v3601_v20 }
 0x1d6   :  { %2945 = vmatpush3.bf16.msra.mxu1 %v3759_v23 }
 0x1d7   :  { %2946 = vmatprep.subr.bf16.mxu1 %v3601_v20 }
 0x1da   :  { %2947 = vmatpush3.bf16.msra.mxu1 %v3763_v24 }
 0x1db   :  { %2948 = vmatprep.subr.bf16.mxu1 %v3601_v20 }
 0x1de   :  { %2949 = vmatpush3.bf16.msra.mxu1 %v3767_v25 }
 0x1df   :  { %2950 = vmatprep.subr.bf16.mxu1 %v3601_v20 }
 0x1e2   :  { %2951 = vmatpush3.bf16.msra.mxu1 %v3771_v27 }
 0x1e3   :  { %2952 = vmatprep.subr.bf16.mxu1 %v3601_v20 }
 0x1e6   :  { %2953 = vmatpush3.bf16.msra.mxu1 %v3776_v32 }
 0x1e7   :  { %2978 = vmatprep.subr.bf16.mxu1 %v3601_v20 }
 0x1e9   :  { %2955 = vmatmul.mubr.bf16.vlgmr.msra.gmra.mrb[16].mxu1 %v1174_v35 }
 0x1ea   :  { %2979 = vmatpush3.bf16.msra.mxu1 %v3746_v19  ;;  %2994 = vmatprep.mubr.msk.bf16.mxu1 %vm3602_vm0, %v3601_v20 }
 0x1eb   :  { %2980 = vmatprep.subr.bf16.mxu1 %v3601_v20 }
 0x1ee   :  { %2981 = vmatpush3.bf16.msra.mxu1 %v3751_v21 }
 0x1ef   :  { %2982 = vmatprep.subr.bf16.mxu1 %v3601_v20 }
 0x1f2   :  { %2983 = vmatpush3.bf16.msra.mxu1 %v3755_v22 }
 0x1f3   :  { %2984 = vmatprep.subr.bf16.mxu1 %v3601_v20 }
 0x1f6   :  { %2985 = vmatpush3.bf16.msra.mxu1 %v3759_v23 }
 0x1f7   :  { %2986 = vmatprep.subr.bf16.mxu1 %v3601_v20 }
 0x1fa   :  { %2987 = vmatpush3.bf16.msra.mxu1 %v3763_v24 }
 0x1fb   :  { %2988 = vmatprep.subr.bf16.mxu1 %v3601_v20 }
 0x1fe   :  { %2989 = vmatpush3.bf16.msra.mxu1 %v3767_v25 }
 0x1ff   :  { %2990 = vmatprep.subr.bf16.mxu1 %v3601_v20 }
 0x202   :  { %2991 = vmatpush3.bf16.msra.mxu1 %v3771_v27 }
 0x203   :  { %2992 = vmatprep.subr.bf16.mxu1 %v3601_v20 }
 0x206   :  { %2993 = vmatpush3.bf16.msra.mxu1 %v3776_v32 }
 0x207   :  { %3018 = vmatprep.subr.bf16.mxu1 %v3601_v20 }
 0x209   :  { %2995 = vmatmul.mubr.bf16.vlgmr.msra.gmra.mrb[20].mxu1 %v1273_v36 }
 0x20a   :  { %3019 = vmatpush3.bf16.msra.mxu1 %v3746_v19  ;;  %3034 = vmatprep.mubr.msk.bf16.mxu1 %vm3602_vm0, %v3601_v20 }
 0x20b   :  { %3020 = vmatprep.subr.bf16.mxu1 %v3601_v20 }
 0x20e   :  { %3021 = vmatpush3.bf16.msra.mxu1 %v3751_v21 }
 0x20f   :  { %3022 = vmatprep.subr.bf16.mxu1 %v3601_v20 }
 0x212   :  { %3023 = vmatpush3.bf16.msra.mxu1 %v3755_v22 }
 0x213   :  { %3024 = vmatprep.subr.bf16.mxu1 %v3601_v20 }
 0x216   :  { %3025 = vmatpush3.bf16.msra.mxu1 %v3759_v23 }
 0x217   :  { %3026 = vmatprep.subr.bf16.mxu1 %v3601_v20 }
 0x21a   :  { %3027 = vmatpush3.bf16.msra.mxu1 %v3763_v24 }
 0x21b   :  { %3028 = vmatprep.subr.bf16.mxu1 %v3601_v20 }
 0x21e   :  { %3029 = vmatpush3.bf16.msra.mxu1 %v3767_v25 }
 0x21f   :  { %3030 = vmatprep.subr.bf16.mxu1 %v3601_v20 }
 0x222   :  { %3031 = vmatpush3.bf16.msra.mxu1 %v3771_v27 }
 0x223   :  { %3032 = vmatprep.subr.bf16.mxu1 %v3601_v20 }
 0x226   :  { %3033 = vmatpush3.bf16.msra.mxu1 %v3776_v32 }
 0x227   :  { %3058 = vmatprep.subr.bf16.mxu1 %v3601_v20 }
 0x229   :  { %3035 = vmatmul.mubr.bf16.vlgmr.msra.gmra.mrb[24].mxu1 %v1372_v37 }
 0x22a   :  { %3059 = vmatpush3.bf16.msra.mxu1 %v3746_v19  ;;  %3074 = vmatprep.mubr.msk.bf16.mxu1 %vm3602_vm0, %v3601_v20 }
 0x22b   :  { %3060 = vmatprep.subr.bf16.mxu1 %v3601_v20 }
 0x22e   :  { %3061 = vmatpush3.bf16.msra.mxu1 %v3751_v21 }
 0x22f   :  { %3062 = vmatprep.subr.bf16.mxu1 %v3601_v20 }
 0x232   :  { %3063 = vmatpush3.bf16.msra.mxu1 %v3755_v22 }
 0x233   :  { %3064 = vmatprep.subr.bf16.mxu1 %v3601_v20 }
 0x236   :  { %3065 = vmatpush3.bf16.msra.mxu1 %v3759_v23 }
 0x237   :  { %3066 = vmatprep.subr.bf16.mxu1 %v3601_v20 }
 0x23a   :  { %3067 = vmatpush3.bf16.msra.mxu1 %v3763_v24 }
 0x23b   :  { %3068 = vmatprep.subr.bf16.mxu1 %v3601_v20 }
 0x23e   :  { %3069 = vmatpush3.bf16.msra.mxu1 %v3767_v25 }
 0x23f   :  { %3070 = vmatprep.subr.bf16.mxu1 %v3601_v20 }
 0x242   :  { %3071 = vmatpush3.bf16.msra.mxu1 %v3771_v27 }
 0x243   :  { %3072 = vmatprep.subr.bf16.mxu1 %v3601_v20 }
 0x246   :  { %3073 = vmatpush3.bf16.msra.mxu1 %v3776_v32 }
 0x247   :  { %3098 = vmatprep.subr.bf16.mxu1 %v3601_v20 }
 0x249   :  { %3075 = vmatmul.mubr.bf16.vlgmr.msra.gmra.mrb[28].mxu1 %v1471_v38 }
 0x24a   :  { %3099 = vmatpush3.bf16.msra.mxu1 %v3746_v19  ;;  %3114 = vmatprep.mubr.msk.bf16.mxu1 %vm3602_vm0, %v3601_v20 }
 0x24b   :  { %3100 = vmatprep.subr.bf16.mxu1 %v3601_v20 }
 0x24e   :  { %3101 = vmatpush3.bf16.msra.mxu1 %v3751_v21 }
 0x24f   :  { %3102 = vmatprep.subr.bf16.mxu1 %v3601_v20 }
 0x252   :  { %3103 = vmatpush3.bf16.msra.mxu1 %v3755_v22 }
 0x253   :  { %3104 = vmatprep.subr.bf16.mxu1 %v3601_v20 }
 0x256   :  { %3105 = vmatpush3.bf16.msra.mxu1 %v3759_v23 }
 0x257   :  { %3106 = vmatprep.subr.bf16.mxu1 %v3601_v20 }
 0x25a   :  { %3107 = vmatpush3.bf16.msra.mxu1 %v3763_v24 }
 0x25b   :  { %3108 = vmatprep.subr.bf16.mxu1 %v3601_v20 }
 0x25e   :  { %3109 = vmatpush3.bf16.msra.mxu1 %v3767_v25 }
 0x25f   :  { %3110 = vmatprep.subr.bf16.mxu1 %v3601_v20 }
 0x262   :  { %3111 = vmatpush3.bf16.msra.mxu1 %v3771_v27 }
 0x263   :  { %3112 = vmatprep.subr.bf16.mxu1 %v3601_v20 }
 0x266   :  { %3113 = vmatpush3.bf16.msra.mxu1 %v3776_v32 }
 0x267   :  { %3138 = vmatprep.subr.bf16.mxu1 %v3601_v20 }
 0x269   :  { %3115 = vmatmul.mubr.bf16.vlgmr.msra.gmra.mrb[32].mxu1 %v1570_v39 }
 0x26a   :  { %3139 = vmatpush3.bf16.msra.mxu1 %v3746_v19  ;;  %3154 = vmatprep.mubr.msk.bf16.mxu1 %vm3602_vm0, %v3601_v20 }
 0x26b   :  { %3140 = vmatprep.subr.bf16.mxu1 %v3601_v20 }
 0x26e   :  { %3141 = vmatpush3.bf16.msra.mxu1 %v3751_v21 }
 0x26f   :  { %3142 = vmatprep.subr.bf16.mxu1 %v3601_v20 }
 0x272   :  { %3143 = vmatpush3.bf16.msra.mxu1 %v3755_v22 }
 0x273   :  { %3144 = vmatprep.subr.bf16.mxu1 %v3601_v20 }
 0x276   :  { %3145 = vmatpush3.bf16.msra.mxu1 %v3759_v23  ;;  %v1669_v23 = vpack.c.bf16 %v3794_v33, %v3794_v33 }
 0x277   :  { %3146 = vmatprep.subr.bf16.mxu1 %v3601_v20 }
 0x27a   :  { %3147 = vmatpush3.bf16.msra.mxu1 %v3763_v24 }
 0x27b   :  { %3148 = vmatprep.subr.bf16.mxu1 %v3601_v20 }
 0x27c   :  { %v3924_v19 = vpop.f32.mrb[8].mxu1 }
 0x27d   :  { %969 = vrot.lane.b32.xlu0 %v3924_v19, %s3603_s5  ;;  %v2876_v21 = vpop.f32.mrb[9].mxu1 }
 0x27e   :  { %3149 = vmatpush3.bf16.msra.mxu1 %v3767_v25  ;;  %v966_v22 = vpop.f32.mrb[10].mxu1 }
 0x27f   :  { %v2877_v40 = vpop.f32.mrb[11].mxu1  ;;  %3150 = vmatprep.subr.bf16.mxu1 %v3601_v20 }
 0x282   :  { %3151 = vmatpush3.bf16.msra.mxu1 %v3771_v27 }
 0x283   :  { %3152 = vmatprep.subr.bf16.mxu1 %v3601_v20 }
 0x286   :  { %3153 = vmatpush3.bf16.msra.mxu1 %v3776_v32 }
 0x289   :  { %3155 = vmatmul.mubr.bf16.vlgmr.msra.gmra.mrb[36].mxu1 %v1669_v23 }
 0x29c   :  { %v3935_v24 = vpop.f32.mrb[12].mxu1 }
 0x29d   :  { %1116 = vrot.lane.b32.xlu0 %v3935_v24, %s3603_s5  ;;  %v2916_v25 = vpop.f32.mrb[13].mxu1 }
 0x29e   :  { %v1113_v41 = vpop.f32.mrb[14].mxu1 }
 0x29f   :  { %v2917_v42 = vpop.f32.mrb[15].mxu1 }
 0x2bc   :  { %v3939_v43 = vpop.f32.mrb[16].mxu1 }
 0x2bd   :  { %v2956_v44 = vpop.f32.mrb[17].mxu1 }
 0x2be   :  { %v1212_v27 = vpop.f32.mrb[18].mxu1 }
 0x2bf   :  { %v2957_v45 = vpop.f32.mrb[19].mxu1 }
 0x2c0   :  { %v3330_v45 = vld [vmem:[#allocation11 + $0x40] sm:$0xff]  }
 0x2c1   :  { %2770 = vmatprep.subr.bf16.mxu1 %v3330_v45 }
 0x2dc   :  { %v3941_v46 = vpop.f32.mrb[20].mxu1 }
 0x2dd   :  { %v2996_v32 = vpop.f32.mrb[21].mxu1 }
 0x2de   :  { %v1311_v47 = vpop.f32.mrb[22].mxu1 }
 0x2df   :  { %v2997_v48 = vpop.f32.mrb[23].mxu1 }
 0x2e0   :  { %v3331_v48 = vld [vmem:[#allocation11] sm:$0xff]  }
 0x2e1   :  { %2771 = vmatpush3.bf16.msra.mxu1 %v3331_v48 }
 0x2ef   :  { %v970_v49 = vpop.permute.xlu0 %969 }
 0x2f0   :  { %v971_v50 = vmax.f32 %v3924_v19, %v970_v49  ;;  %v3332_v49 = vld [vmem:[#allocation11 + $0x48] sm:$0xff]  }
 0x2f1   :  { %2772 = vmatprep.subr.bf16.mxu1 %v3332_v49 }
 0x2f2   :  { %972 = vrot.lane.b32.xlu1 %v971_v50, %s3604_s25 }
 0x2f6   :  { %1215 = vrot.lane.b32.xlu1 %v3939_v43, %s3603_s5 }
 0x2fa   :  { %1314 = vrot.lane.b32.xlu1 %v3941_v46, %s3603_s5 }
 0x2fc   :  { %v3949_v51 = vpop.f32.mrb[24].mxu1 }
 0x2fd   :  { %v3036_v52 = vpop.f32.mrb[25].mxu1 }
 0x2fe   :  { %v1410_v53 = vpop.f32.mrb[26].mxu1 }
 0x2ff   :  { %v3037_v54 = vpop.f32.mrb[27].mxu1  ;;  %v3333_v53 = vld [vmem:[#allocation11 + $0x8] sm:$0xff]  }
 0x300   :  { %2773 = vmatpush3.bf16.msra.mxu1 %v3333_v53 }
 0x30f   :  { %v1117_v57 = vpop.permute.xlu0 %1116 }
 0x310   :  { %v1118_v58 = vmax.f32 %v3935_v24, %v1117_v57  ;;  %v3334_v57 = vld [vmem:[#allocation11 + $0x50] sm:$0xff]  }
 0x311   :  { %2774 = vmatprep.subr.bf16.mxu1 %v3334_v57 }
 0x312   :  { %1119 = vrot.lane.b32.xlu0 %v1118_v58, %s3604_s25 }
 0x31c   :  { %v3969_v61 = vpop.f32.mrb[28].mxu1 }
 0x31d   :  { %v3076_v62 = vpop.f32.mrb[29].mxu1 }
 0x31e   :  { %v1509_v63 = vpop.f32.mrb[30].mxu1 }
 0x31f   :  { %v3077_v1 = vpop.f32.mrb[31].mxu1 }
 0x33c   :  { %v3971_v2 = vpop.f32.mrb[32].mxu1 }
 0x33d   :  { %v3116_v3 = vpop.f32.mrb[33].mxu1 }
 0x33e   :  { %v1608_v4 = vpop.f32.mrb[34].mxu1 }
 0x33f   :  { %v3117_v5 = vpop.f32.mrb[35].mxu1  ;;  %v3335_v4 = vld [vmem:[#allocation11 + $0x10] sm:$0xff]  }
 0x340   :  { %2775 = vmatpush3.bf16.msra.mxu1 %v3335_v4  ;;  %v3336_v5 = vld [vmem:[#allocation11 + $0x58] sm:$0xff]  }
 0x341   :  { %2776 = vmatprep.subr.bf16.mxu1 %v3336_v5  ;;  %v3363_v5 = vld [vmem:[#allocation11 + $0x100] sm:$0xff]  }
 0x35c   :  { %v3973_v6 = vpop.f32.mrb[36].mxu1 }
 0x35d   :  { %v3156_v8 = vpop.f32.mrb[37].mxu1 }
 0x35e   :  { %v1707_v9 = vpop.f32.mrb[38].mxu1  ;;  %v3337_v8 = vld [vmem:[#allocation11 + $0x18] sm:$0xff]  }
 0x35f   :  { %v3157_v10 = vpop.f32.mrb[39].mxu1  ;;  %2777 = vmatpush3.bf16.msra.mxu1 %v3337_v8  ;;  %v3338_v9 = vld [vmem:[#allocation11 + $0x60] sm:$0xff]   ;;  %v3364_v8 = vld [vmem:[#allocation11 + $0x148] sm:$0xff]  }
 0x360   :  { %v3339_v10 = vld [vmem:[#allocation11 + $0x20] sm:$0xff]   ;;  %2778 = vmatprep.subr.bf16.mxu1 %v3338_v9 }
 0x363   :  { %2779 = vmatpush3.bf16.msra.mxu1 %v3339_v10 }
 0x364   :  { %v973_v12 = vpop.permute.xlu1 %972 }
 0x365   :  { %v974_v15 = vmax.f32 %v971_v50, %v973_v12 }
 0x367   :  { %975 = vrot.lane.b32.xlu0 %v974_v15, %s3594_s1 }
 0x368   :  { %v1216_v16 = vpop.permute.xlu1 %1215 }
 0x369   :  { %v1217_v17 = vmax.f32 %v3939_v43, %v1216_v16  ;;  %v3340_v16 = vld [vmem:[#allocation11 + $0x68] sm:$0xff]  }
 0x36a   :  { %2780 = vmatprep.subr.bf16.mxu1 %v3340_v16 }
 0x36b   :  { %1218 = vrot.lane.b32.xlu1 %v1217_v17, %s3604_s25  ;;  %1413 = vrot.lane.b32.xlu0 %v3949_v51, %s3603_s5 }
 0x36c   :  { %v1315_v18 = vpop.permute.xlu1 %1314 }
 0x36d   :  { %v1316_v26 = vmax.f32 %v3941_v46, %v1315_v18  ;;  %v3342_v18 = vld [vmem:[#allocation11 + $0x70] sm:$0xff]  }
 0x36f   :  { %1317 = vrot.lane.b32.xlu0 %v1316_v26, %s3604_s25 }
 0x384   :  { %v1120_v28 = vpop.permute.xlu0 %1119 }
 0x385   :  { %v1121_v29 = vmax.f32 %v1118_v58, %v1120_v28 }
 0x387   :  { %1122 = vrot.lane.b32.xlu1 %v1121_v29, %s3594_s1 }
 0x38b   :  { %1512 = vrot.lane.b32.xlu1 %v3969_v61, %s3603_s5 }
 0x3d9   :  { %v976_v30 = vpop.permute.xlu0 %975 }
 0x3da   :  { %v977_v33 = vmax.f32 %v974_v15, %v976_v30  ;;  %v3345_v30 = vld [vmem:[#allocation11 + $0x38] sm:$0xff]  }
 0x3dc   :  { %v978_v34 = vsub.f32 %v3924_v19, %v977_v33 }
 0x3dd   :  { %v1219_v31 = vpop.permute.xlu1 %1218  ;;  %v1414_v35 = vpop.permute.xlu0 %1413 }
 0x3de   :  { %v979_v36 = vmul.f32 1.442695, %v978_v34  ;;  %v4002_v37 = vmax.f32 %v1217_v17, %v1219_v31  ;;  %v4005_v38 = vmax.f32 %v3949_v51, %v1414_v35  ;;  %v3341_v17 = vld [vmem:[#allocation11 + $0x28] sm:$0xff]  }
 0x3df   :  { %2781 = vmatpush3.bf16.msra.mxu1 %v3341_v17 }
 0x3e0   :  { %3394 = vpow2.f32 %v979_v36  ;;  %1221 = vrot.lane.b32.xlu0 %v4002_v37, %s3594_s1  ;;  %1416 = vrot.lane.b32.xlu1 %v4005_v38, %s3604_s25 }
 0x3e1   :  { %v1318_v39 = vpop.permute.xlu0 %1317  ;;  %2782 = vmatprep.subr.bf16.mxu1 %v3342_v18 }
 0x3e2   :  { %v4011_v21 = vmax.f32 %v1316_v26, %v1318_v39  ;;  %v3343_v26 = vld [vmem:[#allocation11 + $0x30] sm:$0xff]  }
 0x3e3   :  { %2783 = vmatpush3.bf16.msra.mxu1 %v3343_v26 }
 0x3e4   :  { %1320 = vrot.lane.b32.xlu1 %v4011_v21, %s3594_s1  ;;  %1611 = vrot.lane.b32.xlu0 %v3971_v2, %s3603_s5 }
 0x3e8   :  { %1710 = vrot.lane.b32.xlu1 %v3973_v6, %s3603_s5 }
 0x3ea   :  { %v4019_v19 = vpop.eup %3394 }
 0x3eb   :  { %v981_v22 = vpack.c.bf16 %v4019_v19, %v4019_v19 }
 0x3ed   :  { %2895 = vmatmul.mubr.bf16.vlgmr.msra.gmra.mrb[12].mxu0 %v981_v22 }
 0x3ee   :  { %2919 = vmatpush3.bf16.msra.mxu0 %v3951_v55  ;;  %2934 = vmatprep.mubr.msk.bf16.mxu0 %vm3602_vm0, %v3601_v20 }
 0x3ef   :  { %2920 = vmatprep.subr.bf16.mxu0 %v3601_v20 }
 0x3f2   :  { %2921 = vmatpush3.bf16.msra.mxu0 %v3954_v56 }
 0x3f3   :  { %2922 = vmatprep.subr.bf16.mxu0 %v3601_v20 }
 0x3f6   :  { %2923 = vmatpush3.bf16.msra.mxu0 %v3959_v59 }
 0x3f7   :  { %2924 = vmatprep.subr.bf16.mxu0 %v3601_v20 }
 0x3f9   :  { %v1123_v40 = vpop.permute.xlu1 %1122 }
 0x3fa   :  { %v1124_v23 = vmax.f32 %v1121_v29, %v1123_v40  ;;  %2925 = vmatpush3.bf16.msra.mxu0 %v3964_v60  ;;  %v3344_v29 = vld [vmem:[#allocation11 + $0x78] sm:$0xff]  }
 0x3fb   :  { %2926 = vmatprep.subr.bf16.mxu0 %v3601_v20  ;;  %2784 = vmatprep.subr.bf16.mxu1 %v3344_v29 }
 0x3fc   :  { %v1125_v25 = vsub.f32 %v3935_v24, %v1124_v23  ;;  %2785 = vmatpush3.bf16.msra.mxu1 %v3345_v30  ;;  %v3366_v30 = vld [vmem:[#allocation11 + $0x150] sm:$0xff]  }
 0x3fd   :  { %v1513_v41 = vpop.permute.xlu1 %1512 }
 0x3fe   :  { %v1126_v42 = vmul.f32 1.442695, %v1125_v25  ;;  %v4035_v44 = vmax.f32 %v3969_v61, %v1513_v41  ;;  %2927 = vmatpush3.bf16.msra.mxu0 %v3975_v7 }
 0x3ff   :  { %2928 = vmatprep.subr.bf16.mxu0 %v3601_v20 }
 0x400   :  { %3396 = vpow2.f32 %v1126_v42  ;;  %1515 = vrot.lane.b32.xlu0 %v4035_v44, %s3604_s25 }
 0x402   :  { %2929 = vmatpush3.bf16.msra.mxu0 %v3979_v11 }
 0x403   :  { %2930 = vmatprep.subr.bf16.mxu0 %v3601_v20 }
 0x406   :  { %2931 = vmatpush3.bf16.msra.mxu0 %v3983_v13 }
 0x407   :  { %2932 = vmatprep.subr.bf16.mxu0 %v3601_v20 }
 0x40a   :  { %v4045_v24 = vpop.eup %3396  ;;  %2933 = vmatpush3.bf16.msra.mxu0 %v3988_v0 }
 0x40b   :  { %v1128_v27 = vpack.c.bf16 %v4045_v24, %v4045_v24  ;;  %2958 = vmatprep.subr.bf16.mxu0 %v3601_v20 }
 0x40d   :  { %2935 = vmatmul.mubr.bf16.vlgmr.msra.gmra.mrb[16].mxu0 %v1128_v27 }
 0x40e   :  { %2959 = vmatpush3.bf16.msra.mxu0 %v3951_v55  ;;  %2974 = vmatprep.mubr.msk.bf16.mxu0 %vm3602_vm0, %v3601_v20 }
 0x40f   :  { %2960 = vmatprep.subr.bf16.mxu0 %v3601_v20 }
 0x412   :  { %2961 = vmatpush3.bf16.msra.mxu0 %v3954_v56 }
 0x413   :  { %2962 = vmatprep.subr.bf16.mxu0 %v3601_v20 }
 0x416   :  { %2963 = vmatpush3.bf16.msra.mxu0 %v3959_v59 }
 0x417   :  { %2964 = vmatprep.subr.bf16.mxu0 %v3601_v20 }
 0x41a   :  { %2965 = vmatpush3.bf16.msra.mxu0 %v3964_v60 }
 0x41b   :  { %2966 = vmatprep.subr.bf16.mxu0 %v3601_v20 }
 0x41e   :  { %2967 = vmatpush3.bf16.msra.mxu0 %v3975_v7 }
 0x41f   :  { %2968 = vmatprep.subr.bf16.mxu0 %v3601_v20 }
 0x422   :  { %2969 = vmatpush3.bf16.msra.mxu0 %v3979_v11 }
 0x423   :  { %2970 = vmatprep.subr.bf16.mxu0 %v3601_v20 }
 0x426   :  { %2971 = vmatpush3.bf16.msra.mxu0 %v3983_v13 }
 0x427   :  { %2972 = vmatprep.subr.bf16.mxu0 %v3601_v20 }
 0x42a   :  { %2973 = vmatpush3.bf16.msra.mxu0 %v3988_v0 }
 0x42b   :  { %2998 = vmatprep.subr.bf16.mxu0 %v3601_v20 }
 0x452   :  { %v1222_v32 = vpop.permute.xlu0 %1221  ;;  %v1417_v47 = vpop.permute.xlu1 %1416 }
 0x453   :  { %v1223_v50 = vmax.f32 %v4002_v37, %v1222_v32  ;;  %v4071_v52 = vmax.f32 %v4005_v38, %v1417_v47 }
 0x455   :  { %v1224_v54 = vsub.f32 %v3939_v43, %v1223_v50  ;;  %1419 = vrot.lane.b32.xlu0 %v4071_v52, %s3594_s1 }
 0x456   :  { %v1321_v58 = vpop.permute.xlu1 %1320  ;;  %v1612_v62 = vpop.permute.xlu0 %1611 }
 0x457   :  { %v1225_v63 = vmul.f32 1.442695, %v1224_v54  ;;  %v4077_v1 = vmax.f32 %v3971_v2, %v1612_v62  ;;  %v1322_v28 = vmax.f32 %v4011_v21, %v1321_v58 }
 0x459   :  { %3398 = vpow2.f32 %v1225_v63  ;;  %1614 = vrot.lane.b32.xlu1 %v4077_v1, %s3604_s25  ;;  %v1323_v33 = vsub.f32 %v3941_v46, %v1322_v28  ;;  %v3365_v28 = vld [vmem:[#allocation11 + $0x108] sm:$0xff]  }
 0x45a   :  { %v1711_v3 = vpop.permute.xlu1 %1710 }
 0x45b   :  { %v4082_v43 = vmax.f32 %v3973_v6, %v1711_v3  ;;  %v1324_v31 = vmul.f32 1.442695, %v1323_v33  ;;  %v3367_v33 = vld [vmem:[#allocation11 + $0x110] sm:$0xff]  }
 0x45d   :  { %1713 = vrot.lane.b32.xlu1 %v4082_v43, %s3604_s25  ;;  %3400 = vpow2.f32 %v1324_v31  ;;  %v3369_v31 = vld [vmem:[#allocation11 + $0x118] sm:$0xff]  }
 0x463   :  { %v4086_v12 = vpop.eup %3398 }
 0x464   :  { %v1227_v15 = vpack.c.bf16 %v4086_v12, %v4086_v12 }
 0x466   :  { %2975 = vmatmul.mubr.bf16.vlgmr.msra.gmra.mrb[20].mxu0 %v1227_v15 }
 0x467   :  { %2999 = vmatpush3.bf16.msra.mxu0 %v3951_v55  ;;  %3014 = vmatprep.mubr.msk.bf16.mxu0 %vm3602_vm0, %v3601_v20  ;;  %v4113_v46 = vpop.eup %3400 }
 0x468   :  { %3000 = vmatprep.subr.bf16.mxu0 %v3601_v20  ;;  %v1326_v36 = vpack.c.bf16 %v4113_v46, %v4113_v46 }
 0x46b   :  { %3001 = vmatpush3.bf16.msra.mxu0 %v3954_v56 }
 0x46c   :  { %3002 = vmatprep.subr.bf16.mxu0 %v3601_v20 }
 0x46f   :  { %3003 = vmatpush3.bf16.msra.mxu0 %v3959_v59 }
 0x470   :  { %3004 = vmatprep.subr.bf16.mxu0 %v3601_v20 }
 0x472   :  { %v1516_v34 = vpop.permute.xlu0 %1515 }
 0x473   :  { %v4101_v35 = vmax.f32 %v4035_v44, %v1516_v34  ;;  %3005 = vmatpush3.bf16.msra.mxu0 %v3964_v60  ;;  %v3368_v34 = vld [vmem:[#allocation11 + $0x158] sm:$0xff]  }
 0x474   :  { %3006 = vmatprep.subr.bf16.mxu0 %v3601_v20 }
 0x475   :  { %1518 = vrot.lane.b32.xlu0 %v4101_v35, %s3594_s1 }
 0x477   :  { %3007 = vmatpush3.bf16.msra.mxu0 %v3975_v7 }
 0x478   :  { %3008 = vmatprep.subr.bf16.mxu0 %v3601_v20 }
 0x47b   :  { %3009 = vmatpush3.bf16.msra.mxu0 %v3979_v11 }
 0x47c   :  { %3010 = vmatprep.subr.bf16.mxu0 %v3601_v20 }
 0x47f   :  { %3011 = vmatpush3.bf16.msra.mxu0 %v3983_v13 }
 0x480   :  { %3012 = vmatprep.subr.bf16.mxu0 %v3601_v20 }
 0x483   :  { %3013 = vmatpush3.bf16.msra.mxu0 %v3988_v0 }
 0x484   :  { %3038 = vmatprep.subr.bf16.mxu0 %v3601_v20 }
 0x486   :  { %3015 = vmatmul.mubr.bf16.vlgmr.msra.gmra.mrb[24].mxu0 %v1326_v36  ;;  %v3371_v36 = vld [vmem:[#allocation11 + $0x120] sm:$0xff]  }
 0x487   :  { %3039 = vmatpush3.bf16.msra.mxu0 %v3951_v55  ;;  %3054 = vmatprep.mubr.msk.bf16.mxu0 %vm3602_vm0, %v3601_v20 }
 0x488   :  { %3040 = vmatprep.subr.bf16.mxu0 %v3601_v20 }
 0x48b   :  { %3041 = vmatpush3.bf16.msra.mxu0 %v3954_v56 }
 0x48c   :  { %3042 = vmatprep.subr.bf16.mxu0 %v3601_v20 }
 0x48f   :  { %3043 = vmatpush3.bf16.msra.mxu0 %v3959_v59 }
 0x490   :  { %3044 = vmatprep.subr.bf16.mxu0 %v3601_v20 }
 0x493   :  { %3045 = vmatpush3.bf16.msra.mxu0 %v3964_v60 }
 0x494   :  { %3046 = vmatprep.subr.bf16.mxu0 %v3601_v20 }
 0x497   :  { %3047 = vmatpush3.bf16.msra.mxu0 %v3975_v7 }
 0x498   :  { %3048 = vmatprep.subr.bf16.mxu0 %v3601_v20 }
 0x49b   :  { %3049 = vmatpush3.bf16.msra.mxu0 %v3979_v11 }
 0x49c   :  { %3050 = vmatprep.subr.bf16.mxu0 %v3601_v20 }
 0x49f   :  { %3051 = vmatpush3.bf16.msra.mxu0 %v3983_v13 }
 0x4a0   :  { %3052 = vmatprep.subr.bf16.mxu0 %v3601_v20 }
 0x4a3   :  { %3053 = vmatpush3.bf16.msra.mxu0 %v3988_v0 }
 0x4a4   :  { %3078 = vmatprep.subr.bf16.mxu0 %v3601_v20 }
 0x4c0   :  { %v1064_v37 = vpop.f32.mrb[12].mxu0 }
 0x4c1   :  { %v2896_v38 = vpop.f32.mrb[13].mxu0 }
 0x4c2   :  { %v1067_v39 = vpop.f32.mrb[14].mxu0  ;;  %v3372_v38 = vld [vmem:[#allocation11 + $0x168] sm:$0xff]  }
 0x4c3   :  { %v2897_v21 = vpop.f32.mrb[15].mxu0  ;;  %v3373_v39 = vld [vmem:[#allocation11 + $0x128] sm:$0xff]  }
 0x4c4   :  { %v3374_v21 = vld [vmem:[#allocation11 + $0x170] sm:$0xff]  }
 0x4c7   :  { %v1420_v22 = vpop.permute.xlu0 %1419 }
 0x4c8   :  { %v1421_v40 = vmax.f32 %v4071_v52, %v1420_v22 }
 0x4ca   :  { %v1422_v23 = vsub.f32 %v3949_v51, %v1421_v40  ;;  %v3375_v40 = vld [vmem:[#allocation11 + $0x130] sm:$0xff]  }
 0x4cb   :  { %v1615_v25 = vpop.permute.xlu1 %1614 }
 0x4cc   :  { %v1423_v41 = vmul.f32 1.442695, %v1422_v23  ;;  %v4140_v42 = vmax.f32 %v4077_v1, %v1615_v25  ;;  %v3376_v23 = vld [vmem:[#allocation11 + $0x178] sm:$0xff]  }
 0x4ce   :  { %3402 = vpow2.f32 %v1423_v41  ;;  %1617 = vrot.lane.b32.xlu0 %v4140_v42, %s3594_s1 }
 0x4cf   :  { %v1714_v44 = vpop.permute.xlu1 %1713  ;;  %3404 = vrcp.f32 %v1064_v37 }
 0x4d0   :  { %v4145_v27 = vmax.f32 %v4082_v43, %v1714_v44  ;;  %v3362_v43 = vld [vmem:[#allocation11 + $0x140] sm:$0xff]  }
 0x4d1   :  { %2814 = vmatprep.subr.bf16.mxu1 %v3362_v43  ;;  %v3378_v43 = vld [vmem:[#allocation11 + $0x1c0] sm:$0xff]  }
 0x4d2   :  { %1716 = vrot.lane.b32.xlu1 %v4145_v27, %s3594_s1 }
 0x4d8   :  { %v4149_v45 = vpop.eup %3402 }
 0x4d9   :  { %v1425_v51 = vpack.c.bf16 %v4149_v45, %v4149_v45  ;;  %v3405_v50 = vpop.eup %3404 }
 0x4da   :  { %v1071_v54 = vmul.f32 %v3405_v50, %v4019_v19  ;;  %v3352_v50 = vld [vmem:[#allocation11 + $0xd8] sm:$0xff]  }
 0x4db   :  { %3055 = vmatmul.mubr.bf16.vlgmr.msra.gmra.mrb[28].mxu0 %v1425_v51 }
 0x4dc   :  { %3079 = vmatpush3.bf16.msra.mxu0 %v3951_v55  ;;  %3094 = vmatprep.mubr.msk.bf16.mxu0 %vm3602_vm0, %v3601_v20  ;;  %v1072_v1 = vmul.f32 %v1071_v54, %v3784_v14  ;;  %v3356_v54 = vld [vmem:[#allocation11 + $0xe8] sm:$0xff]  }
 0x4dd   :  { %3080 = vmatprep.subr.bf16.mxu0 %v3601_v20 }
 0x4de   :  { %v1073_v19 = vpack.c.bf16 %v1072_v1, %v1072_v1  ;;  %v3360_v1 = vld [vmem:[#allocation11 + $0xf8] sm:$0xff]  }
 0x4e0   :  { %v1163_v32 = vpop.f32.mrb[16].mxu0  ;;  %3081 = vmatpush3.bf16.msra.mxu0 %v3954_v56 }
 0x4e1   :  { %3406 = vrcp.f32 %v1163_v32  ;;  %v2936_v47 = vpop.f32.mrb[17].mxu0  ;;  %3082 = vmatprep.subr.bf16.mxu0 %v3601_v20 }
 0x4e2   :  { %v1166_v48 = vpop.f32.mrb[18].mxu0 }
 0x4e3   :  { %v2937_v49 = vpop.f32.mrb[19].mxu0 }
 0x4e4   :  { %3083 = vmatpush3.bf16.msra.mxu0 %v3959_v59 }
 0x4e5   :  { %3084 = vmatprep.subr.bf16.mxu0 %v3601_v20 }
 0x4e7   :  { %v1519_v52 = vpop.permute.xlu0 %1518 }
 0x4e8   :  { %v1520_v53 = vmax.f32 %v4101_v35, %v1519_v52  ;;  %3085 = vmatpush3.bf16.msra.mxu0 %v3964_v60  ;;  %v3370_v35 = vld [vmem:[#allocation11 + $0x160] sm:$0xff]  }
 0x4e9   :  { %3086 = vmatprep.subr.bf16.mxu0 %v3601_v20  ;;  %v3354_v52 = vld [vmem:[#allocation11 + $0xe0] sm:$0xff]  }
 0x4ea   :  { %v1521_v57 = vsub.f32 %v3969_v61, %v1520_v53  ;;  %v3355_v53 = vld [vmem:[#allocation11 + $0xa0] sm:$0xff]  }
 0x4eb   :  { %v3407_v58 = vpop.eup %3406 }
 0x4ec   :  { %v1522_v62 = vmul.f32 1.442695, %v1521_v57  ;;  %3087 = vmatpush3.bf16.msra.mxu0 %v3975_v7  ;;  %v1170_v63 = vmul.f32 %v3407_v58, %v4045_v24  ;;  %v3357_v57 = vld [vmem:[#allocation11 + $0xa8] sm:$0xff]   ;;  %v3358_v58 = vld [vmem:[#allocation11 + $0xf0] sm:$0xff]  }
 0x4ed   :  { %3088 = vmatprep.subr.bf16.mxu0 %v3601_v20 }
 0x4ee   :  { %3408 = vpow2.f32 %v1522_v62  ;;  %v1171_v3 = vmul.f32 %v1170_v63, %v3784_v14  ;;  %v3359_v63 = vld [vmem:[#allocation11 + $0xb0] sm:$0xff]  }
 0x4f0   :  { %3089 = vmatpush3.bf16.msra.mxu0 %v3979_v11  ;;  %v1172_v4 = vpack.c.bf16 %v1171_v3, %v1171_v3 }
 0x4f1   :  { %3090 = vmatprep.subr.bf16.mxu0 %v3601_v20 }
 0x4f2   :  { %2318 = vmatprep.mubr.bf16.mxu1 %v1172_v4  ;;  %v3361_v4 = vld [vmem:[#allocation11 + $0xb8] sm:$0xff]  }
 0x4f3   :  { %2319 = vmatmul.mubr.bf16.vlgmr.msra.gmra.mrb[40].mxu1 %v1073_v19 }
 0x4f4   :  { %3091 = vmatpush3.bf16.msra.mxu0 %v3983_v13  ;;  %2815 = vmatpush3.bf16.msra.mxu1 %v3363_v5  ;;  %v3379_v5 = vld [vmem:[#allocation11 + $0x180] sm:$0xff]  }
 0x4f5   :  { %3092 = vmatprep.subr.bf16.mxu0 %v3601_v20  ;;  %2816 = vmatprep.subr.bf16.mxu1 %v3364_v8  ;;  %v3380_v8 = vld [vmem:[#allocation11 + $0x1c8] sm:$0xff]  }
 0x4f8   :  { %v4175_v61 = vpop.eup %3408  ;;  %3093 = vmatpush3.bf16.msra.mxu0 %v3988_v0  ;;  %2817 = vmatpush3.bf16.msra.mxu1 %v3365_v28  ;;  %v3385_v28 = vld [vmem:[#allocation11 + $0x198] sm:$0xff]  }
 0x4f9   :  { %v1524_v24 = vpack.c.bf16 %v4175_v61, %v4175_v61  ;;  %3118 = vmatprep.subr.bf16.mxu0 %v3601_v20  ;;  %2818 = vmatprep.subr.bf16.mxu1 %v3366_v30 }
 0x4fb   :  { %3095 = vmatmul.mubr.bf16.vlgmr.msra.gmra.mrb[32].mxu0 %v1524_v24 }
 0x4fc   :  { %3119 = vmatpush3.bf16.msra.mxu0 %v3951_v55  ;;  %3134 = vmatprep.mubr.msk.bf16.mxu0 %vm3602_vm0, %v3601_v20 }
 0x4fd   :  { %3120 = vmatprep.subr.bf16.mxu0 %v3601_v20  ;;  %2819 = vmatpush3.bf16.msra.mxu1 %v3367_v33 }
 0x4fe   :  { %2820 = vmatprep.subr.bf16.mxu1 %v3368_v34 }
 0x500   :  { %3121 = vmatpush3.bf16.msra.mxu0 %v3954_v56 }
 0x501   :  { %3122 = vmatprep.subr.bf16.mxu0 %v3601_v20  ;;  %2821 = vmatpush3.bf16.msra.mxu1 %v3369_v31  ;;  %v3386_v31 = vld [vmem:[#allocation11 + $0x1e0] sm:$0xff]  }
 0x502   :  { %2822 = vmatprep.subr.bf16.mxu1 %v3370_v35 }
 0x504   :  { %3123 = vmatpush3.bf16.msra.mxu0 %v3959_v59 }
 0x505   :  { %3124 = vmatprep.subr.bf16.mxu0 %v3601_v20  ;;  %2823 = vmatpush3.bf16.msra.mxu1 %v3371_v36  ;;  %v3387_v36 = vld [vmem:[#allocation11 + $0x1a0] sm:$0xff]  }
 0x506   :  { %2824 = vmatprep.subr.bf16.mxu1 %v3372_v38  ;;  %v3388_v38 = vld [vmem:[#allocation11 + $0x1e8] sm:$0xff]  }
 0x508   :  { %3125 = vmatpush3.bf16.msra.mxu0 %v3964_v60 }
 0x509   :  { %3126 = vmatprep.subr.bf16.mxu0 %v3601_v20  ;;  %2825 = vmatpush3.bf16.msra.mxu1 %v3373_v39  ;;  %v3390_v39 = vld [vmem:[#allocation11 + $0x1f0] sm:$0xff]  }
 0x50a   :  { %2826 = vmatprep.subr.bf16.mxu1 %v3374_v21 }
 0x50c   :  { %3127 = vmatpush3.bf16.msra.mxu0 %v3975_v7 }
 0x50d   :  { %3128 = vmatprep.subr.bf16.mxu0 %v3601_v20  ;;  %2827 = vmatpush3.bf16.msra.mxu1 %v3375_v40  ;;  %v3391_v40 = vld [vmem:[#allocation11 + $0x1b0] sm:$0xff]  }
 0x50e   :  { %2828 = vmatprep.subr.bf16.mxu1 %v3376_v23 }
 0x510   :  { %3129 = vmatpush3.bf16.msra.mxu0 %v3979_v11 }
 0x511   :  { %3130 = vmatprep.subr.bf16.mxu0 %v3601_v20 }
 0x514   :  { %3131 = vmatpush3.bf16.msra.mxu0 %v3983_v13 }
 0x515   :  { %3132 = vmatprep.subr.bf16.mxu0 %v3601_v20 }
 0x518   :  { %3133 = vmatpush3.bf16.msra.mxu0 %v3988_v0 }
 0x519   :  { %3158 = vmatprep.subr.bf16.mxu0 %v3601_v20 }
 0x539   :  { %v4199_v9 = vpop.f32.mrb[20].mxu0 }
 0x53a   :  { %v2976_v10 = vpop.f32.mrb[21].mxu0 }
 0x53b   :  { %v1265_v15 = vpop.f32.mrb[22].mxu0 }
 0x53c   :  { %v2977_v16 = vpop.f32.mrb[23].mxu0  ;;  %v3382_v15 = vld [vmem:[#allocation11 + $0x1d0] sm:$0xff]  }
 0x540   :  { %v1618_v17 = vpop.permute.xlu0 %1617 }
 0x541   :  { %v1619_v18 = vmax.f32 %v4140_v42, %v1618_v17 }
 0x543   :  { %v1620_v26 = vsub.f32 %v3971_v2, %v1619_v18  ;;  %v3383_v18 = vld [vmem:[#allocation11 + $0x190] sm:$0xff]  }
 0x544   :  { %v1717_v22 = vpop.permute.xlu1 %1716 }
 0x545   :  { %v1621_v29 = vmul.f32 1.442695, %v1620_v26  ;;  %v1718_v25 = vmax.f32 %v4145_v27, %v1717_v22  ;;  %v3384_v26 = vld [vmem:[#allocation11 + $0x1d8] sm:$0xff]  }
 0x547   :  { %3410 = vpow2.f32 %v1621_v29  ;;  %v1719_v32 = vsub.f32 %v3973_v6, %v1718_v25  ;;  %v3346_v6 = vld [vmem:[#allocation11 + $0xc0] sm:$0xff]   ;;  %v3392_v25 = vld [vmem:[#allocation11 + $0x1f8] sm:$0xff]  }
 0x549   :  { %v1720_v27 = vmul.f32 1.442695, %v1719_v32 }
 0x551   :  { %v4203_v37 = vpop.eup %3410 }
 0x552   :  { %v1623_v2 = vpack.c.bf16 %v4203_v37, %v4203_v37 }
 0x554   :  { %3135 = vmatmul.mubr.bf16.vlgmr.msra.gmra.mrb[36].mxu0 %v1623_v2  ;;  %v3389_v2 = vld [vmem:[#allocation11 + $0x1a8] sm:$0xff]  }
 0x555   :  { %3159 = vmatpush3.bf16.msra.mxu0 %v3951_v55  ;;  %3174 = vmatprep.mubr.msk.bf16.mxu0 %vm3602_vm0, %v3601_v20  ;;  %v3377_v55 = vld [vmem:[#allocation11 + $0x138] sm:$0xff]  }
 0x556   :  { %3160 = vmatprep.subr.bf16.mxu0 %v3601_v20  ;;  %2829 = vmatpush3.bf16.msra.mxu1 %v3377_v55 }
 0x559   :  { %v1361_v41 = vpop.f32.mrb[24].mxu0  ;;  %3161 = vmatpush3.bf16.msra.mxu0 %v3954_v56 }
 0x55a   :  { %v3016_v42 = vpop.f32.mrb[25].mxu0  ;;  %3162 = vmatprep.subr.bf16.mxu0 %v3601_v20  ;;  %3412 = vrcp.f32 %v1361_v41 }
 0x55b   :  { %v1364_v44 = vpop.f32.mrb[26].mxu0  ;;  %3414 = vpow2.f32 %v1720_v27  ;;  %v3393_v42 = vld [vmem:[#allocation11 + $0x1b8] sm:$0xff]  }
 0x55c   :  { %v3017_v51 = vpop.f32.mrb[27].mxu0  ;;  %3416 = vrcp.f32 %v4199_v9  ;;  %v3381_v9 = vld [vmem:[#allocation11 + $0x188] sm:$0xff]  }
 0x55d   :  { %3163 = vmatpush3.bf16.msra.mxu0 %v3959_v59 }
 0x55e   :  { %3164 = vmatprep.subr.bf16.mxu0 %v3601_v20 }
 0x561   :  { %3165 = vmatpush3.bf16.msra.mxu0 %v3964_v60 }
 0x562   :  { %3166 = vmatprep.subr.bf16.mxu0 %v3601_v20 }
 0x564   :  { %v3413_v56 = vpop.eup %3412 }
 0x565   :  { %3167 = vmatpush3.bf16.msra.mxu0 %v3975_v7  ;;  %v1368_v59 = vmul.f32 %v3413_v56, %v4113_v46  ;;  %v4226_v60 = vpop.eup %3414  ;;  %v3347_v7 = vld [vmem:[#allocation11 + $0x80] sm:$0xff]   ;;  %v3351_v46 = vld [vmem:[#allocation11 + $0x90] sm:$0xff]  }
 0x566   :  { %3168 = vmatprep.subr.bf16.mxu0 %v3601_v20  ;;  %v1722_v48 = vpack.c.bf16 %v4226_v60, %v4226_v60  ;;  %v3417_v62 = vpop.eup %3416 }
 0x567   :  { %v1369_v47 = vmul.f32 %v1368_v59, %v3784_v14  ;;  %v1269_v3 = vmul.f32 %v3417_v62, %v4086_v12 }
 0x569   :  { %3169 = vmatpush3.bf16.msra.mxu0 %v3979_v11  ;;  %v3348_v11 = vld [vmem:[#allocation11 + $0xc8] sm:$0xff]   ;;  %v1370_v49 = vpack.c.bf16 %v1369_v47, %v1369_v47  ;;  %v1270_v19 = vmul.f32 %v1269_v3, %v3784_v14 }
 0x56a   :  { %3170 = vmatprep.subr.bf16.mxu0 %v3601_v20 }
 0x56b   :  { %v1271_v24 = vpack.c.bf16 %v1270_v19, %v1270_v19 }
 0x56d   :  { %3171 = vmatpush3.bf16.msra.mxu0 %v3983_v13  ;;  %v3349_v13 = vld [vmem:[#allocation11 + $0x88] sm:$0xff]  }
 0x56e   :  { %3172 = vmatprep.subr.bf16.mxu0 %v3601_v20  ;;  %v3350_v20 = vld [vmem:[#allocation11 + $0xd0] sm:$0xff]  }
 0x571   :  { %3173 = vmatpush3.bf16.msra.mxu0 %v3988_v0  ;;  %v3353_v0 = vld [vmem:[#allocation11 + $0x98] sm:$0xff]  }
 0x572   :  { %2792 = vmatprep.subr.bf16.mxu0 %v3346_v6 }
 0x574   :  { %3175 = vmatmul.mubr.bf16.vlgmr.msra.gmra.mrb[40].mxu0 %v1722_v48 }
 0x575   :  { %2793 = vmatpush3.bf16.msra.mxu0 %v3347_v7  ;;  %2358 = vmatprep.mubr.bf16.mxu0 %v1370_v49 }
 0x576   :  { %2794 = vmatprep.subr.bf16.mxu0 %v3348_v11 }
 0x579   :  { %2795 = vmatpush3.bf16.msra.mxu0 %v3349_v13 }
 0x57a   :  { %2796 = vmatprep.subr.bf16.mxu0 %v3350_v20 }
 0x57d   :  { %2797 = vmatpush3.bf16.msra.mxu0 %v3351_v46 }
 0x57e   :  { %2798 = vmatprep.subr.bf16.mxu0 %v3352_v50 }
 0x581   :  { %2799 = vmatpush3.bf16.msra.mxu0 %v3353_v0 }
 0x582   :  { %2800 = vmatprep.subr.bf16.mxu0 %v3354_v52 }
 0x585   :  { %2801 = vmatpush3.bf16.msra.mxu0 %v3355_v53 }
 0x586   :  { %2802 = vmatprep.subr.bf16.mxu0 %v3356_v54 }
 0x589   :  { %2803 = vmatpush3.bf16.msra.mxu0 %v3357_v57 }
 0x58a   :  { %2804 = vmatprep.subr.bf16.mxu0 %v3358_v58  ;;  %v2561_v58 = vld [vmem:[%s4264_s6] ss:$0 sm:$0xff]  ;;  %s3558_s6 = scalar_lea.vmem %s2454_s28, 128 }
 0x58b   :  { %p3559_p6 = scmp.ne.s32.totalorder %s2454_s28, %s3558_s6  ;;  %p3564_p8 = scmp.lt.s32.totalorder %s3558_s6, %s3558_s6 }
 0x58d   :  { %2805 = vmatpush3.bf16.msra.mxu0 %v3359_v63  ;;  %p3565_p9 = por %p3564_p8, %p3563_p7 }
 0x58e   :  { %2806 = vmatprep.subr.bf16.mxu0 %v3360_v1 }
 0x58f   :  { %p3566_p10 = pnand %p3565_p9, %p3559_p6 }
 0x591   :  { %2807 = vmatpush3.bf16.msra.mxu0 %v3361_v4 }
 0x592   :  { %2836 = vmatprep.subr.bf16.mxu0 %v3378_v43 }
 0x594   :  { %2359 = vmatmul.mubr.bf16.vlgmr.msra.gmra.mrb[44].mxu0 %v1271_v24 }
 0x595   :  { %2837 = vmatpush3.bf16.msra.mxu0 %v3379_v5 }
 0x596   :  { %2838 = vmatprep.subr.bf16.mxu0 %v3380_v8 }
 0x599   :  { %2839 = vmatpush3.bf16.msra.mxu0 %v3381_v9 }
 0x59a   :  { %2840 = vmatprep.subr.bf16.mxu0 %v3382_v15 }
 0x59d   :  { %2841 = vmatpush3.bf16.msra.mxu0 %v3383_v18 }
 0x59e   :  { %2842 = vmatprep.subr.bf16.mxu0 %v3384_v26 }
 0x5a1   :  { %2843 = vmatpush3.bf16.msra.mxu0 %v3385_v28 }
 0x5a2   :  { %2844 = vmatprep.subr.bf16.mxu0 %v3386_v31 }
 0x5a5   :  { %2845 = vmatpush3.bf16.msra.mxu0 %v3387_v36 }
 0x5a6   :  { %2846 = vmatprep.subr.bf16.mxu0 %v3388_v38 }
 0x5a9   :  { %2847 = vmatpush3.bf16.msra.mxu0 %v3389_v2 }
 0x5aa   :  { %2848 = vmatprep.subr.bf16.mxu0 %v3390_v39 }
 0x5ad   :  { %2849 = vmatpush3.bf16.msra.mxu0 %v3391_v40 }
 0x5ae   :  { %v1460_v10 = vpop.f32.mrb[28].mxu0  ;;  %2850 = vmatprep.subr.bf16.mxu0 %v3392_v25 }
 0x5af   :  { %v3056_v16 = vpop.f32.mrb[29].mxu0  ;;  %3418 = vrcp.f32 %v1460_v10 }
 0x5b0   :  { %v1463_v17 = vpop.f32.mrb[30].mxu0 }
 0x5b1   :  { %v3057_v12 = vpop.f32.mrb[31].mxu0  ;;  %2851 = vmatpush3.bf16.msra.mxu0 %v3393_v42 }
 0x5b9   :  { %v3419_v55 = vpop.eup %3418 }
 0x5ba   :  { %v1467_v44 = vmul.f32 %v3419_v55, %v4149_v45 }
 0x5bc   :  { %v1468_v27 = vmul.f32 %v1467_v44, %v3784_v14 }
 0x5be   :  { %v1469_v6 = vpack.c.bf16 %v1468_v27, %v1468_v27 }
 0x5c6   :  { %v2786_v29 = vpop.f32.mrb[40].mxu1 }
 0x5c7   :  { %v2787_v30 = vpop.f32.mrb[41].mxu1 }
 0x5c8   :  { %v2788_v33 = vadd.f32 %v2787_v30, %v2786_v29  ;;  %v2789_v34 = vpop.f32.mrb[42].mxu1 }
 0x5c9   :  { %v2790_v35 = vpop.f32.mrb[43].mxu1 }
 0x5ca   :  { %v2321_v1 = vadd.f32 %v2788_v33, %v2561_v58 }
 0x5ce   :  { %v1559_v21 = vpop.f32.mrb[32].mxu0 }
 0x5cf   :  { %3420 = vrcp.f32 %v1559_v21  ;;  %v3096_v22 = vpop.f32.mrb[33].mxu0 }
 0x5d0   :  { %v1562_v23 = vpop.f32.mrb[34].mxu0 }
 0x5d1   :  { %v3097_v41 = vpop.f32.mrb[35].mxu0 }
 0x5d9   :  { %v3421_v51 = vpop.eup %3420 }
 0x5da   :  { %v1566_v32 = vmul.f32 %v3421_v51, %v4175_v61 }
 0x5dc   :  { %v1567_v56 = vmul.f32 %v1566_v32, %v3784_v14 }
 0x5de   :  { %v1568_v59 = vpack.c.bf16 %v1567_v56, %v1567_v56 }
 0x5e0   :  { %2398 = vmatprep.mubr.bf16.mxu1 %v1568_v59 }
 0x5e1   :  { %2399 = vmatmul.mubr.bf16.vlgmr.msra.gmra.mrb[44].mxu1 %v1469_v6 }
 0x627   :  { %v1658_v47 = vpop.f32.mrb[36].mxu0 }
 0x628   :  { %v3136_v7 = vpop.f32.mrb[37].mxu0  ;;  %3422 = vrcp.f32 %v1658_v47 }
 0x629   :  { %v1661_v48 = vpop.f32.mrb[38].mxu0 }
 0x62a   :  { %v3137_v11 = vpop.f32.mrb[39].mxu0 }
 0x632   :  { %v3423_v46 = vpop.eup %3422 }
 0x633   :  { %v1665_v61 = vmul.f32 %v3423_v46, %v4203_v37 }
 0x635   :  { %v1666_v52 = vmul.f32 %v1665_v61, %v3784_v14 }
 0x637   :  { %v1667_v57 = vpack.c.bf16 %v1666_v52, %v1666_v52 }
 0x647   :  { %v1757_v49 = vpop.f32.mrb[40].mxu0 }
 0x648   :  { %3424 = vrcp.f32 %v1757_v49  ;;  %v3176_v45 = vpop.f32.mrb[41].mxu0 }
 0x649   :  { %v1760_v13 = vpop.f32.mrb[42].mxu0 }
 0x64a   :  { %v3177_v20 = vpop.f32.mrb[43].mxu0 }
 0x652   :  { %v3425_v50 = vpop.eup %3424 }
 0x653   :  { %v1764_v0 = vmul.f32 %v3425_v50, %v4226_v60 }
 0x655   :  { %v1765_v53 = vmul.f32 %v1764_v0, %v3784_v14 }
 0x657   :  { %v1766_v54 = vpack.c.bf16 %v1765_v53, %v1765_v53 }
 0x659   :  { %2438 = vmatprep.mubr.bf16.mxu0 %v1766_v54 }
 0x65a   :  { %2439 = vmatmul.mubr.bf16.vlgmr.msra.gmra.mrb[48].mxu0 %v1667_v57 }
 0x667   :  { %v2808_v62 = vpop.f32.mrb[44].mxu0 }
 0x668   :  { %v2809_v63 = vpop.f32.mrb[45].mxu0 }
 0x669   :  { %v2810_v3 = vadd.f32 %v2809_v63, %v2808_v62  ;;  %v2811_v37 = vpop.f32.mrb[46].mxu0 }
 0x66a   :  { %v2812_v4 = vpop.f32.mrb[47].mxu0 }
 0x66b   :  { %v2361_v19 = vadd.f32 %v2810_v3, %v2321_v1 }
 0x6b4   :  { %v2830_v60 = vpop.f32.mrb[44].mxu1 }
 0x6b5   :  { %v2831_v24 = vpop.f32.mrb[45].mxu1 }
 0x6b6   :  { %v2832_v43 = vadd.f32 %v2831_v24, %v2830_v60  ;;  %v2833_v5 = vpop.f32.mrb[46].mxu1 }
 0x6b7   :  { %v2834_v14 = vpop.f32.mrb[47].mxu1 }
 0x6b8   :  { %v2401_v8 = vadd.f32 %v2832_v43, %v2361_v19 }
 0x72d   :  { %v2852_v9 = vpop.f32.mrb[48].mxu0 }
 0x72e   :  { %v2853_v10 = vpop.f32.mrb[49].mxu0 }
 0x72f   :  { %v2854_v15 = vadd.f32 %v2853_v10, %v2852_v9  ;;  %v2855_v16 = vpop.f32.mrb[50].mxu0 }
 0x730   :  { %v2856_v17 = vpop.f32.mrb[51].mxu0 }
 0x731   :  { %v2441_v12 = vadd.f32 %v2854_v15, %v2401_v8 }
 0x733   :  { %2446 = vst [vmem:[#allocation13] sm:$0xff] %v2441_v12 }
 0x734   :  { %3569 = shalt.err (!%p3566_p10)
}
 0x735   :  { %s3570_s9 = scalar_lea.hbm %s4265_s7, 128 }
 0x736   :  { %p3571_p11 = scmp.ne.s32.totalorder %s4265_s7, %s3570_s9  ;;  %p3574_p12 = scmp.lt.u32.totalorder %s3570_s9, %s4265_s7 }
 0x738   :  { %p3576_p13 = pnand %p3574_p12, %p3571_p11 }
 0x73a   :  { %3579 = shalt.err (!%p3576_p13)
}
 0x73b   :  { %2456 = dma.vmem_to_hbm [thread:$0]  %s2454_s28, 128, %s4265_s7, [#allocation4]  }
 0x73c   :  { %3588 = dma.done.wait [#allocation4], 128  }
 0x73d   :  { %3589 = vsyncadd [#allocation4], 4294967168 }
 0x73e   :  { %2460 = vsyncpa [#allocation3], 1 }
 0x73f   :  { %2461 = vsyncpa [#allocation6], 1 }
 0x740   :  { %2462 = vsyncpa [#allocation9], 1 }
 0x741   :  { %2463 = vsyncpa [#allocation12], 1 }
 0x742   :  { %2464 = vsyncpa [#allocation4], 1 }

</bundles_post_ra>
